<compile_context>
chip_gen: v5e
topology: v5e:2x2
jax: 0.10.0
libtpu: 0.0.40
codegen_flags: <defaults>
</compile_context>

<pallas_src>
import functools

import jax
import jax.numpy as jnp
from jax.experimental import pallas as pl
from jax.experimental.pallas import tpu as pltpu


def _round_up(x, m):
    return (x + m - 1) // m * m


def _make_conv_kernel(KH, KW, stride, Wps, lin, TM, num_m):
    """Builds the kernel body; all arguments are static Python ints."""

    def kernel(x_ref, w_ref, o_ref):
        # x_ref: (1, stride*stride*lin, Cin_p)  bf16 phase-flattened padded image
        # w_ref: (KH*KW, Cin_p, Cout_p)         bf16 grid-invariant weight taps
        # o_ref: (1, TM, Cout_p)                output tile (lane-dense stores)
        cout_p = o_ref.shape[2]
        if num_m == 1:
            m_base = 0                                    # fully static slices
        else:
            m_base = pl.multiple_of(pl.program_id(1) * TM, TM)

        acc = jnp.zeros((TM, cout_p), jnp.float32)
        for kh in range(KH):
            for kw in range(KW):
                # Polyphase index of this tap and its flat row offset: tap
                # (kh, kw) of a stride-s conv reads phase (kh%s, kw%s) at a
                # constant row shift of (kh//s)*Wps + kw//s.
                phase = (kh % stride) * stride + (kw % stride)
                off = (kh // stride) * Wps + (kw // stride)
                start = phase * lin + off
                xt = x_ref[0, pl.ds(m_base + start, TM), :]   # (TM, Cin_p)
                wt = w_ref[kh * KW + kw]                      # (Cin_p, Cout_p)
                # Weight-stationary MXU matmul, f32 accumulation.
                acc = acc + jnp.dot(xt, wt, preferred_element_type=jnp.float32)
        o_ref[0] = acc.astype(o_ref.dtype)

    return kernel


@functools.partial(jax.jit, static_argnames=("stride", "padding"))
def basic_conv2d(x_nchw, weight_oihw, *, stride, padding):
    """BasicConv2d.forward: Conv2d(..., bias=False).  NCHW in, NCHW out."""
    # TODO(synk): groups / dilation / tuple kernel-stride-padding Conv2d
    # kwargs are not implemented.
    N, Cin, H, W = x_nchw.shape
    Cout, Cin_w, KH, KW = weight_oihw.shape
    assert Cin == Cin_w and stride >= 1 and padding >= 0

    s = stride
    Ho = (H + 2 * padding - KH) // s + 1
    Wo = (W + 2 * padding - KW) // s + 1

    # Polyphase geometry: phase (ph, pw) holds x_pad[hh*s+ph, ww*s+pw], so
    # every tap of the strided conv becomes a contiguous window.
    Hps = -(-(H + 2 * padding) // s)
    Wps = -(-(W + 2 * padding) // s)
    # Flat output rows are (ho, w') with w' in [0, Wps); columns w' >= Wo are
    # garbage (wrap-around) and cropped in the wrapper -> <=(Wps-Wo)/Wo extra work.
    M = Ho * Wps
    o_max = ((KH - 1) // s) * Wps + (KW - 1) // s        # largest tap offset

    # Pixel-tile selection: whole image when small, 512-row tiles when big.
    if M <= 1024:
        TM, num_m = _round_up(M, 8), 1                   # static in-kernel slices
    else:
        TM = 512
        num_m = -(-M // TM)
    Mp = TM * num_m
    lin = _round_up(max(Hps * Wps, Mp + o_max), 8)       # per-phase flat length

    operand_dtype = jnp.bfloat16
    out_dtype = x_nchw.dtype
    Cin_p = _round_up(Cin, 8)                            # sublane-friendly K
    Cout_p = _round_up(Cout, 128)                        # lane-dense output

    # ------- wrapper-side layout plumbing (single fused XLA pass, ~1x bytes) -------
    # NCHW -> NHWC -> zero-pad to (s*Hps, s*Wps) -> polyphase -> flat rows.
    x = jnp.transpose(x_nchw, (0, 2, 3, 1))
    x = jnp.pad(x, ((0, 0),
                    (padding, s * Hps - H - padding),
                    (padding, s * Wps - W - padding),
                    (0, Cin_p - Cin)))
    x = x.reshape(N, Hps, s, Wps, s, Cin_p)
    x = jnp.transpose(x, (0, 2, 4, 1, 3, 5))             # (N, ph, pw, hh, ww, C)
    x = x.reshape(N, s * s, Hps * Wps, Cin_p)
    x = jnp.pad(x, ((0, 0), (0, 0), (0, lin - Hps * Wps), (0, 0)))
    x = x.reshape(N, s * s * lin, Cin_p).astype(operand_dtype)

    # OIHW -> (KH*KW, Cin_p, Cout_p): per-tap weight-stationary RHS.
    w = jnp.transpose(weight_oihw, (2, 3, 1, 0)).reshape(KH * KW, Cin, Cout)
    w = jnp.pad(w, ((0, 0), (0, Cin_p - Cin), (0, Cout_p - Cout)))
    w = w.astype(operand_dtype)

    # ------- pallas_call -------
    x_blk_bytes = s * s * lin * _round_up(Cin_p, 128) * 2   # lane-padded bf16
    w_blk_bytes = KH * KW * _round_up(Cin_p, 16) * Cout_p * 2
    o_blk_bytes = TM * Cout_p * jnp.dtype(out_dtype).itemsize
    vmem_need = 2 * (x_blk_bytes + w_blk_bytes + o_blk_bytes)
    vmem_limit = int(min(max(32 << 20, vmem_need + (4 << 20)), 48 << 20))

    cost = pl.CostEstimate(
        flops=2 * N * Mp * Cout_p * KH * KW * Cin_p,
        transcendentals=0,
        bytes_accessed=(x.size * x.dtype.itemsize + w.size * w.dtype.itemsize
                        + N * Mp * Cout_p * jnp.dtype(out_dtype).itemsize),
    )

    kernel = _make_conv_kernel(KH, KW, s, Wps, lin, TM, num_m)
    out_flat = pl.pallas_call(
        kernel,
        out_shape=jax.ShapeDtypeStruct((N, Mp, Cout_p), out_dtype),
        grid=(N, num_m),
        in_specs=[
            # Whole phase-flattened image; block index is constant in m, so
            # the pipeline fetches it once per image, not once per m-tile.
            pl.BlockSpec((1, s * s * lin, Cin_p), lambda n, m: (n, 0, 0)),
            # Grid-invariant weight (a few KiB): fetched once, held in VMEM.
            pl.BlockSpec((KH * KW, Cin_p, Cout_p), lambda n, m: (0, 0, 0)),
        ],
        out_specs=pl.BlockSpec((1, TM, Cout_p), lambda n, m: (n, m, 0)),
        compiler_params=pltpu.CompilerParams(
            dimension_semantics=("parallel", "parallel"),
            vmem_limit_bytes=vmem_limit,
        ),
        cost_estimate=cost,
    )(x, w)

    # Crop garbage columns / channel padding; reshape back to NCHW.
    out = out_flat[:, :M, :Cout].reshape(N, Ho, Wps, Cout)[:, :, :Wo, :]
    return jnp.transpose(out, (0, 3, 1, 2))


def _reference(x, w, stride, padding):
    # Same operand rounding as the kernel (bf16 operands, f32 accumulation).
    return jax.lax.conv_general_dilated(
        x.astype(jnp.bfloat16), w.astype(jnp.bfloat16),
        window_strides=(stride, stride),
        padding=[(padding, padding), (padding, padding)],
        dimension_numbers=("NCHW", "OIHW", "NCHW"),
        preferred_element_type=jnp.float32).astype(jnp.float32)


if __name__ == "__main__":
    key = jax.random.PRNGKey(0)
    kx, kw1, kw2 = jax.random.split(key, 3)

    N, Cin, H, W = 2, 4, 16, 16
    KH = KW = 3
    x = jax.random.normal(kx, (N, Cin, H, W), dtype=jnp.float32)
    fan_in = Cin * KH * KW

    # BasicConv2d(4, 8, kernel_size=3, stride=1, padding=1)
    Cout1 = 8
    w1 = jax.random.normal(kw1, (Cout1, Cin, KH, KW), jnp.float32) * (
        2.0 / fan_in) ** 0.5
    out1 = jax.block_until_ready(basic_conv2d(x, w1, stride=1, padding=1))
    ref1 = _reference(x, w1, 1, 1)
    assert out1.shape == (N, Cout1, 16, 16), out1.shape
    err1 = float(jnp.max(jnp.abs(out1.astype(jnp.float32) - ref1)))
    assert err1 < 2e-3, err1

    # BasicConv2d(4, 16, kernel_size=3, stride=2, padding=1)
    Cout2 = 16
    w2 = jax.random.normal(kw2, (Cout2, Cin, KH, KW), jnp.float32) * (
        2.0 / fan_in) ** 0.5
    out2 = jax.block_until_ready(basic_conv2d(x, w2, stride=2, padding=1))
    ref2 = _reference(x, w2, 2, 1)
    assert out2.shape == (N, Cout2, 8, 8), out2.shape
    err2 = float(jnp.max(jnp.abs(out2.astype(jnp.float32) - ref2)))
    assert err2 < 2e-3, err2

    print("KERNEL_OK")
</pallas_src>

<mosaic_0001>
module attributes {stable_mosaic.version = 11 : i64} {
  func.func @kernel(%arg0: i32, %arg1: i32, %arg2: memref<1x328x8xbf16, #tpu.memory_space<vmem>>, %arg3: memref<9x8x128xbf16, #tpu.memory_space<vmem>>, %arg4: memref<1x288x128xf32, #tpu.memory_space<vmem>>) attributes {dimension_semantics = [#tpu.dimension_semantics<parallel>, #tpu.dimension_semantics<parallel>], iteration_bounds = array<i64: 2, 1>, scalar_prefetch = 0 : i64, scratch_operands = 0 : i64, tpu.core_type = #tpu.core_type<tc>, window_params = [{transform_indices = @transform_0, window_bounds = array<i64: 1, 328, 8>}, {pipeline_mode = #tpu.pipeline_mode<synchronous>, transform_indices = @transform_1, window_bounds = array<i64: 9, 8, 128>}, {transform_indices = @transform_2, window_bounds = array<i64: 1, 288, 128>}]} {
    %cst = arith.constant 0.000000e+00 : f32
    %0 = vector.broadcast %cst : f32 to vector<288x128xf32>
    %c0 = arith.constant 0 : index
    %c0_0 = arith.constant 0 : index
    %c0_1 = arith.constant 0 : index
    %1 = vector.load %arg2[%c0, %c0_0, %c0_1] : memref<1x328x8xbf16, #tpu.memory_space<vmem>>, vector<1x288x8xbf16>
    %2 = vector.shape_cast %1 : vector<1x288x8xbf16> to vector<288x8xbf16>
    %c0_2 = arith.constant 0 : index
    %c0_3 = arith.constant 0 : index
    %c0_4 = arith.constant 0 : index
    %3 = vector.load %arg3[%c0_2, %c0_3, %c0_4] : memref<9x8x128xbf16, #tpu.memory_space<vmem>>, vector<1x8x128xbf16>
    %4 = vector.shape_cast %3 : vector<1x8x128xbf16> to vector<8x128xbf16>
    %cst_5 = arith.constant dense<0.000000e+00> : vector<288x128xf32>
    %5 = tpu.matmul %2, %4, %cst_5 {dimension_numbers = #tpu.dot_dimension_numbers<[1], [0], [0], [1], [0, 0, 1, 1], [], []>} : vector<288x8xbf16>, vector<8x128xbf16>, vector<288x128xf32> -> vector<288x128xf32>
    %6 = arith.addf %0, %5 : vector<288x128xf32>
    %c0_6 = arith.constant 0 : index
    %c1 = arith.constant 1 : index
    %c0_7 = arith.constant 0 : index
    %7 = vector.load %arg2[%c0_6, %c1, %c0_7] : memref<1x328x8xbf16, #tpu.memory_space<vmem>>, vector<1x288x8xbf16>
    %8 = vector.shape_cast %7 : vector<1x288x8xbf16> to vector<288x8xbf16>
    %c1_8 = arith.constant 1 : index
    %c0_9 = arith.constant 0 : index
    %c0_10 = arith.constant 0 : index
    %9 = vector.load %arg3[%c1_8, %c0_9, %c0_10] : memref<9x8x128xbf16, #tpu.memory_space<vmem>>, vector<1x8x128xbf16>
    %10 = vector.shape_cast %9 : vector<1x8x128xbf16> to vector<8x128xbf16>
    %cst_11 = arith.constant dense<0.000000e+00> : vector<288x128xf32>
    %11 = tpu.matmul %8, %10, %cst_11 {dimension_numbers = #tpu.dot_dimension_numbers<[1], [0], [0], [1], [0, 0, 1, 1], [], []>} : vector<288x8xbf16>, vector<8x128xbf16>, vector<288x128xf32> -> vector<288x128xf32>
    %12 = arith.addf %6, %11 : vector<288x128xf32>
    %c0_12 = arith.constant 0 : index
    %c2 = arith.constant 2 : index
    %c0_13 = arith.constant 0 : index
    %13 = vector.load %arg2[%c0_12, %c2, %c0_13] : memref<1x328x8xbf16, #tpu.memory_space<vmem>>, vector<1x288x8xbf16>
    %14 = vector.shape_cast %13 : vector<1x288x8xbf16> to vector<288x8xbf16>
    %c2_14 = arith.constant 2 : index
    %c0_15 = arith.constant 0 : index
    %c0_16 = arith.constant 0 : index
    %15 = vector.load %arg3[%c2_14, %c0_15, %c0_16] : memref<9x8x128xbf16, #tpu.memory_space<vmem>>, vector<1x8x128xbf16>
    %16 = vector.shape_cast %15 : vector<1x8x128xbf16> to vector<8x128xbf16>
    %cst_17 = arith.constant dense<0.000000e+00> : vector<288x128xf32>
    %17 = tpu.matmul %14, %16, %cst_17 {dimension_numbers = #tpu.dot_dimension_numbers<[1], [0], [0], [1], [0, 0, 1, 1], [], []>} : vector<288x8xbf16>, vector<8x128xbf16>, vector<288x128xf32> -> vector<288x128xf32>
    %18 = arith.addf %12, %17 : vector<288x128xf32>
    %c0_18 = arith.constant 0 : index
    %c18 = arith.constant 18 : index
    %c0_19 = arith.constant 0 : index
    %19 = vector.load %arg2[%c0_18, %c18, %c0_19] : memref<1x328x8xbf16, #tpu.memory_space<vmem>>, vector<1x288x8xbf16>
    %20 = vector.shape_cast %19 : vector<1x288x8xbf16> to vector<288x8xbf16>
    %c3 = arith.constant 3 : index
    %c0_20 = arith.constant 0 : index
    %c0_21 = arith.constant 0 : index
    %21 = vector.load %arg3[%c3, %c0_20, %c0_21] : memref<9x8x128xbf16, #tpu.memory_space<vmem>>, vector<1x8x128xbf16>
    %22 = vector.shape_cast %21 : vector<1x8x128xbf16> to vector<8x128xbf16>
    %cst_22 = arith.constant dense<0.000000e+00> : vector<288x128xf32>
    %23 = tpu.matmul %20, %22, %cst_22 {dimension_numbers = #tpu.dot_dimension_numbers<[1], [0], [0], [1], [0, 0, 1, 1], [], []>} : vector<288x8xbf16>, vector<8x128xbf16>, vector<288x128xf32> -> vector<288x128xf32>
    %24 = arith.addf %18, %23 : vector<288x128xf32>
    %c0_23 = arith.constant 0 : index
    %c19 = arith.constant 19 : index
    %c0_24 = arith.constant 0 : index
    %25 = vector.load %arg2[%c0_23, %c19, %c0_24] : memref<1x328x8xbf16, #tpu.memory_space<vmem>>, vector<1x288x8xbf16>
    %26 = vector.shape_cast %25 : vector<1x288x8xbf16> to vector<288x8xbf16>
    %c4 = arith.constant 4 : index
    %c0_25 = arith.constant 0 : index
    %c0_26 = arith.constant 0 : index
    %27 = vector.load %arg3[%c4, %c0_25, %c0_26] : memref<9x8x128xbf16, #tpu.memory_space<vmem>>, vector<1x8x128xbf16>
    %28 = vector.shape_cast %27 : vector<1x8x128xbf16> to vector<8x128xbf16>
    %cst_27 = arith.constant dense<0.000000e+00> : vector<288x128xf32>
    %29 = tpu.matmul %26, %28, %cst_27 {dimension_numbers = #tpu.dot_dimension_numbers<[1], [0], [0], [1], [0, 0, 1, 1], [], []>} : vector<288x8xbf16>, vector<8x128xbf16>, vector<288x128xf32> -> vector<288x128xf32>
    %30 = arith.addf %24, %29 : vector<288x128xf32>
    %c0_28 = arith.constant 0 : index
    %c20 = arith.constant 20 : index
    %c0_29 = arith.constant 0 : index
    %31 = vector.load %arg2[%c0_28, %c20, %c0_29] : memref<1x328x8xbf16, #tpu.memory_space<vmem>>, vector<1x288x8xbf16>
    %32 = vector.shape_cast %31 : vector<1x288x8xbf16> to vector<288x8xbf16>
    %c5 = arith.constant 5 : index
    %c0_30 = arith.constant 0 : index
    %c0_31 = arith.constant 0 : index
    %33 = vector.load %arg3[%c5, %c0_30, %c0_31] : memref<9x8x128xbf16, #tpu.memory_space<vmem>>, vector<1x8x128xbf16>
    %34 = vector.shape_cast %33 : vector<1x8x128xbf16> to vector<8x128xbf16>
    %cst_32 = arith.constant dense<0.000000e+00> : vector<288x128xf32>
    %35 = tpu.matmul %32, %34, %cst_32 {dimension_numbers = #tpu.dot_dimension_numbers<[1], [0], [0], [1], [0, 0, 1, 1], [], []>} : vector<288x8xbf16>, vector<8x128xbf16>, vector<288x128xf32> -> vector<288x128xf32>
    %36 = arith.addf %30, %35 : vector<288x128xf32>
    %c0_33 = arith.constant 0 : index
    %c36 = arith.constant 36 : index
    %c0_34 = arith.constant 0 : index
    %37 = vector.load %arg2[%c0_33, %c36, %c0_34] : memref<1x328x8xbf16, #tpu.memory_space<vmem>>, vector<1x288x8xbf16>
    %38 = vector.shape_cast %37 : vector<1x288x8xbf16> to vector<288x8xbf16>
    %c6 = arith.constant 6 : index
    %c0_35 = arith.constant 0 : index
    %c0_36 = arith.constant 0 : index
    %39 = vector.load %arg3[%c6, %c0_35, %c0_36] : memref<9x8x128xbf16, #tpu.memory_space<vmem>>, vector<1x8x128xbf16>
    %40 = vector.shape_cast %39 : vector<1x8x128xbf16> to vector<8x128xbf16>
    %cst_37 = arith.constant dense<0.000000e+00> : vector<288x128xf32>
    %41 = tpu.matmul %38, %40, %cst_37 {dimension_numbers = #tpu.dot_dimension_numbers<[1], [0], [0], [1], [0, 0, 1, 1], [], []>} : vector<288x8xbf16>, vector<8x128xbf16>, vector<288x128xf32> -> vector<288x128xf32>
    %42 = arith.addf %36, %41 : vector<288x128xf32>
    %c0_38 = arith.constant 0 : index
    %c37 = arith.constant 37 : index
    %c0_39 = arith.constant 0 : index
    %43 = vector.load %arg2[%c0_38, %c37, %c0_39] : memref<1x328x8xbf16, #tpu.memory_space<vmem>>, vector<1x288x8xbf16>
    %44 = vector.shape_cast %43 : vector<1x288x8xbf16> to vector<288x8xbf16>
    %c7 = arith.constant 7 : index
    %c0_40 = arith.constant 0 : index
    %c0_41 = arith.constant 0 : index
    %45 = vector.load %arg3[%c7, %c0_40, %c0_41] : memref<9x8x128xbf16, #tpu.memory_space<vmem>>, vector<1x8x128xbf16>
    %46 = vector.shape_cast %45 : vector<1x8x128xbf16> to vector<8x128xbf16>
    %cst_42 = arith.constant dense<0.000000e+00> : vector<288x128xf32>
    %47 = tpu.matmul %44, %46, %cst_42 {dimension_numbers = #tpu.dot_dimension_numbers<[1], [0], [0], [1], [0, 0, 1, 1], [], []>} : vector<288x8xbf16>, vector<8x128xbf16>, vector<288x128xf32> -> vector<288x128xf32>
    %48 = arith.addf %42, %47 : vector<288x128xf32>
    %c0_43 = arith.constant 0 : index
    %c38 = arith.constant 38 : index
    %c0_44 = arith.constant 0 : index
    %49 = vector.load %arg2[%c0_43, %c38, %c0_44] : memref<1x328x8xbf16, #tpu.memory_space<vmem>>, vector<1x288x8xbf16>
    %50 = vector.shape_cast %49 : vector<1x288x8xbf16> to vector<288x8xbf16>
    %c8 = arith.constant 8 : index
    %c0_45 = arith.constant 0 : index
    %c0_46 = arith.constant 0 : index
    %51 = vector.load %arg3[%c8, %c0_45, %c0_46] : memref<9x8x128xbf16, #tpu.memory_space<vmem>>, vector<1x8x128xbf16>
    %52 = vector.shape_cast %51 : vector<1x8x128xbf16> to vector<8x128xbf16>
    %cst_47 = arith.constant dense<0.000000e+00> : vector<288x128xf32>
    %53 = tpu.matmul %50, %52, %cst_47 {dimension_numbers = #tpu.dot_dimension_numbers<[1], [0], [0], [1], [0, 0, 1, 1], [], []>} : vector<288x8xbf16>, vector<8x128xbf16>, vector<288x128xf32> -> vector<288x128xf32>
    %54 = arith.addf %48, %53 : vector<288x128xf32>
    %c0_48 = arith.constant 0 : index
    %c0_49 = arith.constant 0 : index
    %c0_50 = arith.constant 0 : index
    %55 = vector.load %arg4[%c0_48, %c0_49, %c0_50] : memref<1x288x128xf32, #tpu.memory_space<vmem>>, vector<1x288x128xf32>
    %56 = vector.shape_cast %55 : vector<1x288x128xf32> to vector<288x128xf32>
    %57 = vector.shape_cast %54 : vector<288x128xf32> to vector<1x288x128xf32>
    tpu.vector_store %arg4[%c0_48, %c0_49, %c0_50], %57 {strides = array<i32>} : memref<1x288x128xf32, #tpu.memory_space<vmem>>, vector<1x288x128xf32>,
    return
  }
  func.func @transform_0(%arg0: i32, %arg1: i32) -> (i32, i32, i32) {
    %c0_i32 = arith.constant 0 : i32
    %c0_i32_0 = arith.constant 0 : i32
    %c0_i32_1 = arith.constant 0 : i32
    return %arg0, %c0_i32, %c0_i32_0 : i32, i32, i32
  }
  func.func @transform_1(%arg0: i32, %arg1: i32) -> (i32, i32, i32) {
    %c0_i32 = arith.constant 0 : i32
    %c0_i32_0 = arith.constant 0 : i32
    %c0_i32_1 = arith.constant 0 : i32
    %c0_i32_2 = arith.constant 0 : i32
    return %c0_i32, %c0_i32_0, %c0_i32_1 : i32, i32, i32
  }
  func.func @transform_2(%arg0: i32, %arg1: i32) -> (i32, i32, i32) {
    %c0_i32 = arith.constant 0 : i32
    %c0_i32_0 = arith.constant 0 : i32
    return %arg0, %arg1, %c0_i32 : i32, i32, i32
  }
}

</mosaic_0001>

<bundles_post_ra>
// kernel: basic_conv2d.1
= control target key start
LH: loop header
LB: loop body
LE: loop exit
PB: predicated region body
PF: predicated region fallthrough
CT: control target
= control target key end

     0   :  { %s3560_s9 = smov 0   ;;  %s3562_s10 = smov 0   ;;  %s4556_s0 = inlined_call_operand.vmem [shape: bf16[2,328,8], index: 0, kind: input, shape index: {}]   ;;  %s4557_s1 = inlined_call_operand.vmem [shape: bf16[9,8,128], index: 1, kind: input, shape index: {}]   ;;  %s4558_s2 = inlined_call_operand.vmem [shape: f32[2,288,128], index: 2, kind: output, shape index: {}]  }
   0x1   :  { %s3564_s11 = smov 0  }
   0x2 LB: > { %s24_s12 = sadd.s32 1, %s3539_s10  ;;  %p3035_p0 = scmp.ge.s32.totalorder %s3543_s11, 1  ;;  %s3543_s11 = sphi %s3564_s11, %s12_s11   ;;  %s3539_s10 = sphi %s3562_s10, %s4584_s10   ;;  %s3535_s9 = sphi %s3560_s9, %s4583_s9  }
   0x3   : > { %p26_p1 = scmp.ge.s32.totalorder %s24_s12, 2  ;;  %p126_p2 = scmp.lt.s32.totalorder %s3543_s11, 3 }
   0x5   : > { %s4586_s12 = smov (%p26_p1, %s24_s12), 0  ;;  %p127_p3 = pnand %p3035_p0, %p126_p2 }
   0x7   : > { %130 = sbr.rel (%p127_p3) target bundleno = 814 (0x32e), region = 28 }
   0xc   : > { %v3038_v0 = vld [vmem:[%s4557_s1 + $0x4] sm:$0xf]  ;;  %vm505_vm0 = vcmask 1043456   ;;  %p152_p4 = scmp.lt.s32.totalorder %s3535_s9, 1  ;;  %v3143_v2 = vld [vmem:[%s4557_s1 + $0x8] sm:$0xf] }
   0xd   : > { %v507_v1 = vsel %vm505_vm0, %v3038_v0, 0  ;;  %v204_v3 = vld [vmem:[%s4557_s1] sm:$0xf]  ;;  %v845_v4 = vsel %vm505_vm0, %v3143_v2, 0  ;;  %v3249_v6 = vld [vmem:[%s4557_s1 + $0x10] sm:$0xf] }
   0xe   : > { %3472 = vmatpush.bf16.msra.mxu1 %v507_v1  ;;  %3473 = vmatpush.bf16.msra.mxu2 %v507_v1  ;;  %s4588_s9 = smov (!%p152_p4, %s3535_s9), 1  ;;  %v645_v5 = vsel %vm505_vm0, %v204_v3, 0  ;;  %v1575_v7 = vsel %vm505_vm0, %v3249_v6, 0  ;;  %vm301_vm1 = vsmask.f32 7424  ;;  %vm450_vm2 = vcmask 64512  }
   0xf   : > { %516 = vmatpush.bf16.msra.mxu0 %v507_v1  ;;  %s3475_s21 = smul.u32 164, %s4588_s9  ;;  %3474 = vmatpush.bf16.msra.mxu3 %v507_v1  ;;  %v3162_v45 = vld [vmem:[%s4557_s1 + $0xc] sm:$0xf]  ;;  %vm752_vm3 = vcmask 1046528   ;;  %vm1349_vm4 = vsmask.f32 6400 }
  0x10   : > { %v1206_v53 = vsel %vm505_vm0, %v3162_v45, 0  ;;  %vm2315_vm5 = vsmask.f32 5376  ;;  %vm1718_vm6 = vcmask 1045504   ;;  %vm2684_vm7 = vcmask 1044480   ;;  %s3476_s7 = smul.u32 288, %s4588_s9 }
  0x11   : > { %s3600_s24 = scalar_lea.vmem %s4556_s0, %s3475_s21 }
  0x12   : > { %854 = vmatpush.bf16.msrb.mxu2 %v845_v4  ;;  %654 = vmatpush.bf16.msrb.mxu1 %v645_v5  ;;  %v3603_v8 = vld [vmem:[%s3600_s24 + $0x28] sm:$0xff]  ;;  %v3606_v9 = vld [vmem:[%s3600_s24 + $0x30] sm:$0xff]  ;;  %v3612_v11 = vld [vmem:[%s3600_s24 + $0x58] sm:$0xff]  ;;  %s4343_s14 = scalar_lea.vmem %s4558_s2, %s3476_s7 }
  0x13   : > { %1584 = vmatpush.bf16.msrb.mxu0 %v1575_v7  ;;  %v3609_v10 = vld [vmem:[%s3600_s24 + $0x50] sm:$0xff]  ;;  %v3615_v12 = vld [vmem:[%s3600_s24] sm:$0xff]   ;;  %v3618_v13 = vld [vmem:[%s3600_s24 + $0x8] sm:$0xff]  ;;  %v342_v14 = vshll.u32 %v3603_v8, 16  ;;  %v346_v15 = vshrl.u32 %v3603_v8, 16  ;;  %v350_v16 = vshll.u32 %v3606_v9, 16  ;;  %1215 = vmatpush.bf16.msrb.mxu3 %v1206_v53 }
  0x14   : > { %v382_v17 = vshll.u32 %v3609_v10, 16  ;;  %v386_v18 = vshrl.u32 %v3609_v10, 16  ;;  %v390_v19 = vshll.u32 %v3612_v11, 16  ;;  %v303_v20 = vshrl.u32 %v3615_v12, 16  ;;  %v3636_v31 = vld [vmem:[%s3600_s24 + $0x78] sm:$0xff]  ;;  %v3429_v32 = vld [vmem:[%s3600_s24 + $0x80] sm:$0xff] }
  0x15   : > { %v305_v21 = vshll.u32 %v3615_v12, 16  ;;  %v3628_v22 = vrot.slane %v342_v14, 1  ;;  %v352_v23 = vrot.slane %v350_v16, 1  ;;  %v310_v25 = vshll.u32 %v3618_v13, 16  ;;  %v3645_v37 = vld [vmem:[%s3600_s24 + $0x38] sm:$0xff]  ;;  %v3649_v38 = vld [vmem:[%s3600_s24 + $0x60] sm:$0xff] }
  0x16   : > { %v3630_v24 = vrot.slane %v382_v17, 1  ;;  %v392_v26 = vrot.slane %v390_v19, 1  ;;  %v422_v39 = vshll.u32 %v3636_v31, 16  ;;  %v426_v40 = vshrl.u32 %v3636_v31, 16  ;;  %v3654_v42 = vld [vmem:[%s3600_s24 + $0x10] sm:$0xff]  ;;  %v3430_v59 = vld [vmem:[%s3600_s24 + $0x88] sm:$0xff] }
  0x17   : > { %v307_v27 = vrot.slane %v305_v21, 1  ;;  %v348_v28 = vor.u32 %v346_v15, %v3628_v22  ;;  %v312_v30 = vrot.slane %v310_v25, 1  ;;  %v430_v41 = vshll.u32 %v3429_v32, 16  ;;  %v3673_v60 = vld [vmem:[%s3600_s24 + $0x48] sm:$0xff]  ;;  %v3682_v5 = vld [vmem:[%s3600_s24 + $0x40] sm:$0xff]  ;;  %v3690_v17 = vld [vmem:[%s3600_s24 + $0x18] sm:$0xff] }
  0x18   : > { %v388_v29 = vor.u32 %v386_v18, %v3630_v24  ;;  %v3656_v43 = vrot.slane %v422_v39, 1  ;;  %v354_v46 = vshrl.u32 %v3606_v9, 16  ;;  %v358_v47 = vshll.u32 %v3645_v37, 16  ;;  %v3685_v6 = vld [vmem:[%s3600_s24 + $0x68] sm:$0xff]  ;;  %v205_v18 = vld [vmem:[%s3600_s24 + $0x90] sm:$0x1] }
  0x19   : > { %v308_v33 = vor.u32 %v307_v27, %v303_v20  ;;  %v353_v34 = vsel %vm301_vm1, %v348_v28, %v352_v23  ;;  %v432_v44 = vrot.slane %v430_v41, 1  ;;  %v394_v48 = vshrl.u32 %v3612_v11, 16  ;;  %v3699_v27 = vld [vmem:[%s3600_s24 + $0x20] sm:$0xff] }
  0x1a   : > { %v393_v35 = vsel %vm301_vm1, %v388_v29, %v392_v26  ;;  %3112 = vmatmul.msk.bf16.vlgmr.msra.gmra.mxu1 %vm450_vm2, %v353_v34  ;;  %v398_v49 = vshll.u32 %v3649_v38, 16  ;;  %v428_v50 = vor.u32 %v426_v40, %v3656_v43  ;;  %v314_v51 = vshrl.u32 %v3618_v13, 16 }
  0x1b   : > { %3117 = vmatmul.msk.bf16.vlgmr.msra.gmra.mxu2 %vm450_vm2, %v393_v35  ;;  %v313_v36 = vsel %vm301_vm1, %v308_v33, %v312_v30  ;;  %v318_v52 = vshll.u32 %v3654_v42, 16  ;;  %v356_v55 = vor.u32 %v354_v46, %v352_v23  ;;  %v360_v56 = vrot.slane %v358_v47, 1 }
  0x1c   : > { %3107 = vmatmul.msk.bf16.vlgmr.msra.gmra.mxu0 %vm450_vm2, %v313_v36  ;;  %v433_v54 = vsel %vm301_vm1, %v428_v50, %v432_v44  ;;  %v396_v57 = vor.u32 %v394_v48, %v392_v26  ;;  %v400_v58 = vrot.slane %v398_v49, 1  ;;  %v316_v61 = vor.u32 %v314_v51, %v312_v30 }
  0x1d   : > { %3122 = vmatmul.msk.bf16.vlgmr.msra.gmra.mxu3 %vm450_vm2, %v433_v54  ;;  %v320_v62 = vrot.slane %v318_v52, 1  ;;  %v361_v63 = vsel %vm301_vm1, %v356_v55, %v360_v56  ;;  %v434_v1 = vshrl.u32 %v3429_v32, 16  ;;  %v438_v2 = vshll.u32 %v3430_v59, 16  ;;  %v3720_v52 = vld [vmem:[%s3600_s24 + $0x70] sm:$0xff] }
  0x1e   : > { %v401_v0 = vsel %vm301_vm1, %v396_v57, %v400_v58  ;;  %v374_v3 = vshll.u32 %v3673_v60, 16  ;;  %v378_v16 = vshrl.u32 %v3673_v60, 16  ;;  %v362_v20 = vshrl.u32 %v3645_v37, 16 }
  0x1f   : > { %v321_v4 = vsel %vm301_vm1, %v316_v61, %v320_v62  ;;  %v436_v7 = vor.u32 %v434_v1, %v432_v44  ;;  %v440_v14 = vrot.slane %v438_v2, 1  ;;  %v366_v21 = vshll.u32 %v3682_v5, 16 }
  0x20   : > { %v376_v15 = vrot.slane %v374_v3, 1  ;;  %v402_v23 = vshrl.u32 %v3649_v38, 16  ;;  %v406_v25 = vshll.u32 %v3685_v6, 16  ;;  %v281_v28 = vunpack.c.l.b16 %v205_v18 }
  0x21   : > { %v441_v26 = vsel %vm301_vm1, %v436_v7, %v440_v14  ;;  %v322_v30 = vshrl.u32 %v3654_v42, 16  ;;  %v326_v32 = vshll.u32 %v3690_v17, 16  ;;  %v364_v33 = vor.u32 %v362_v20, %v360_v56  ;;  %v3431_v7 = vld [vmem:[%s3600_s24 + $0x10] sm:$0xff] }
  0x22   : > { %v380_v19 = vor.u32 %v378_v16, %v376_v15  ;;  %v368_v34 = vrot.slane %v366_v21, 1  ;;  %v404_v35 = vor.u32 %v402_v23, %v400_v58  ;;  %v408_v36 = vrot.slane %v406_v25, 1  ;;  %v3287_v21 = vld [vmem:[%s4557_s1 + $0x18] sm:$0xf]  ;;  %v3374_v25 = vld [vmem:[%s4557_s1 + $0x1c] sm:$0xf] }
  0x23   : > { %v334_v39 = vshll.u32 %v3699_v27, 16  ;;  %v3709_v40 = vpack.c.b16 %v281_v28, %v281_v28  ;;  %v324_v41 = vor.u32 %v322_v30, %v320_v62  ;;  %v328_v44 = vrot.slane %v326_v32, 1  ;;  %v982_v62 = vld [vmem:[%s3600_s24 + $0x8] sm:$0xe]  ;;  %v3393_v32 = vld [vmem:[%s4557_s1 + $0x20] sm:$0xf] }
  0x24   : > { %v3703_v29 = vsel %vm301_vm1, %v380_v19, %v3630_v24  ;;  %v369_v24 = vsel %vm301_vm1, %v364_v33, %v368_v34  ;;  %v409_v45 = vsel %vm301_vm1, %v404_v35, %v408_v36  ;;  %v442_v47 = vshrl.u32 %v3430_v59, 16 }
  0x25   : > { %v336_v46 = vrot.slane %v334_v39, 1  ;;  %v446_v48 = vshll.u32 %v3709_v40, 16  ;;  %v338_v49 = vshrl.u32 %v3699_v27, 16  ;;  %v329_v50 = vsel %vm301_vm1, %v324_v41, %v328_v44  ;;  %v3432_v41 = vld [vmem:[%s3600_s24 + $0x18] sm:$0xff] }
  0x26   : > { %v444_v53 = vor.u32 %v442_v47, %v440_v14  ;;  %v370_v56 = vshrl.u32 %v3682_v5, 16  ;;  %v410_v57 = vshrl.u32 %v3685_v6, 16  ;;  %v414_v58 = vshll.u32 %v3720_v52, 16 }
  0x27   : > { %v340_v51 = vor.u32 %v338_v49, %v336_v46  ;;  %v448_v54 = vrot.slane %v446_v48, 1  ;;  %v330_v61 = vshrl.u32 %v3690_v17, 16  ;;  %v1058_v3 = vunpack.c.l.b16 %v982_v62 }
  0x28   : > { %v412_v1 = vor.u32 %v410_v57, %v408_v36  ;;  %v416_v2 = vrot.slane %v414_v58, 1  ;;  %v1115_v20 = vrot.slane %v3431_v7, 1  ;;  %v2541_v28 = vsel %vm505_vm0, %v3374_v25, 0 }
  0x29   : > { %v345_v55 = vsel %vm301_vm1, %v340_v51, %v3628_v22  ;;  %v449_v59 = vsel %vm301_vm1, %v444_v53, %v448_v54  ;;  %2550 = vmatpush.bf16.msra.mxu3 %v2541_v28  ;;  %v2777_v33 = vsel %vm505_vm0, %v3393_v32, 0  ;;  %v1359_v48 = vshrl.u32 %v3431_v7, 16 }
  0x2a   : > { %3113 = vmatmul.msk.bf16.gmra.mxu1 %vm450_vm2, %v361_v63  ;;  %v3731_v63 = vld [vmem:[%s3600_s24 + $0xc] sm:$0xf]  ;;  %v417_v16 = vsel %vm301_vm1, %v412_v1, %v416_v2  ;;  %2786 = vmatpush.bf16.msra.mxu0 %v2777_v33  ;;  %v1362_v49 = vshll.u32 %v3431_v7, 16  ;;  %v1368_v1 = vshrl.u32 %v3432_v41, 16  ;;  %v758_v28 = vrot.slane %v3690_v17, 1  ;;  %v3435_v33 = vld [vmem:[%s3600_s24 + $0x30] sm:$0xff] }
  0x2b   : > { %3118 = vmatmul.msk.bf16.gmra.mxu2 %vm450_vm2, %v401_v0  ;;  %v372_v0 = vor.u32 %v370_v56, %v368_v34  ;;  %v4559_v22 = vunpack.c.l.b16 %v3731_v63  ;;  %v418_v34 = vshrl.u32 %v3720_v52, 16  ;;  %v1361_v54 = vrot.slane %v1359_v48, 1 }
  0x2c   : > { %3108 = vmatmul.msk.bf16.gmra.mxu0 %vm450_vm2, %v321_v4  ;;  %v332_v4 = vor.u32 %v330_v61, %v328_v44  ;;  %v3469_v44 = vld [vmem:[%s3600_s24] sm:$0xf0]  ;;  %v1364_v56 = vrot.slane %v1362_v49, 2 }
  0x2d   : > { %3123 = vmatmul.msk.bf16.gmra.mxu3 %vm450_vm2, %v441_v26  ;;  %v377_v14 = vsel %vm301_vm1, %v372_v0, %v376_v15  ;;  %v1095_v18 = vpack.c.b16 %v4559_v22, %v1058_v3  ;;  %v2172_v15 = vsel %vm505_vm0, %v3287_v21, 0  ;;  %v3268_v26 = vld [vmem:[%s4557_s1 + $0x14] sm:$0xf]  ;;  %v420_v36 = vor.u32 %v418_v34, %v416_v2  ;;  %v3433_v61 = vld [vmem:[%s3600_s24 + $0x20] sm:$0xff] }
  0x2e   : > { %v337_v19 = vsel %vm301_vm1, %v332_v4, %v336_v46  ;;  %2181 = vmatpush.bf16.msra.mxu2 %v2172_v15  ;;  %v1811_v30 = vsel %vm505_vm0, %v3268_v26, 0  ;;  %v1365_v58 = vor.u32 %v1364_v56, %v1361_v54  ;;  %v1119_v0 = vrot.slane %v3433_v61, 1  ;;  %v3441_v22 = vld [vmem:[%s3600_s24 + $0x60] sm:$0xff] }
  0x2f   : > { %v1114_v23 = vrot.slane %v1095_v18, 1  ;;  %1820 = vmatpush.bf16.msra.mxu1 %v1811_v30  ;;  %v425_v39 = vsel %vm301_vm1, %v420_v36, %v3656_v43  ;;  %v1351_v46 = vshrl.u32 %v1095_v18, 16  ;;  %v1354_v47 = vshll.u32 %v1095_v18, 16 }
  0x30   : > { %v1371_v2 = vshll.u32 %v3432_v41, 16  ;;  %v1370_v4 = vrot.slane %v1368_v1, 1  ;;  %v1377_v21 = vshrl.u32 %v3433_v61, 16  ;;  %v1123_v34 = vrot.slane %v3435_v33, 1  ;;  %v3437_v1 = vld [vmem:[%s3600_s24 + $0x40] sm:$0xff] }
  0x31   : > { %v1116_v35 = vsel %vm752_vm3, %v1114_v23, %v1115_v20  ;;  %v1353_v43 = vrot.slane %v1351_v46, 1  ;;  %v1356_v53 = vrot.slane %v1354_v47, 2  ;;  %v1380_v23 = vshll.u32 %v3433_v61, 16  ;;  %v3436_v47 = vld [vmem:[%s3600_s24 + $0x38] sm:$0xff] }
  0x32   : > { %v1373_v7 = vrot.slane %v1371_v2, 2  ;;  %v1379_v25 = vrot.slane %v1377_v21, 1 }
  0x33   : > { %v1357_v57 = vor.u32 %v1356_v53, %v1353_v43  ;;  %v1382_v26 = vrot.slane %v1380_v23, 2  ;;  %v1398_v43 = vshll.u32 %v3435_v33, 16  ;;  %v764_v23 = vrot.slane %v3606_v9, 1 }
  0x35   : > { %v1366_v62 = vsel %vm1349_vm4, %v1357_v57, %v1365_v58  ;;  %v1383_v30 = vor.u32 %v1382_v26, %v1379_v25  ;;  %v1400_v57 = vrot.slane %v1398_v43, 2 }
  0x3a   : > { %3114 = vmatmul.msk.bf16.gmra.mxu1 %vm450_vm2, %v369_v24  ;;  %v1117_v24 = vrot.slane %v3432_v41, 1 }
  0x3b   : > { %3119 = vmatmul.msk.bf16.gmra.mxu2 %vm450_vm2, %v409_v45  ;;  %v3470_v45 = vld [vmem:[%s3600_s24] sm:$0xe] }
  0x3c   : > { %3109 = vmatmul.msk.bf16.gmra.mxu0 %vm450_vm2, %v329_v50  ;;  %v3471_v50 = vor.u32 %v3470_v45, %v3469_v44  ;;  %v1118_v51 = vsel %vm752_vm3, %v1115_v20, %v1117_v24  ;;  %v1120_v3 = vsel %vm752_vm3, %v1117_v24, %v1119_v0  ;;  %v760_v24 = vrot.slane %v3699_v27, 1 }
  0x3d   : > { %3124 = vmatmul.msk.bf16.gmra.mxu3 %vm450_vm2, %v449_v59 }
  0x4a   : > { %3115 = vmatmul.msk.bf16.gmra.mxu1 %vm450_vm2, %v377_v14  ;;  %v756_v14 = vrot.slane %v3654_v42, 1 }
  0x4b   : > { %3120 = vmatmul.msk.bf16.gmra.mxu2 %vm450_vm2, %v417_v16  ;;  %v1374_v16 = vor.u32 %v1373_v7, %v1370_v4  ;;  %v1127_v4 = vrot.slane %v3437_v1, 1  ;;  %v1404_v7 = vshrl.u32 %v3436_v47, 16 }
  0x4c   : > { %3110 = vmatmul.msk.bf16.gmra.mxu0 %vm450_vm2, %v337_v19  ;;  %v759_v32 = vsel %vm752_vm3, %v756_v14, %v758_v28 }
  0x4d   : > { %3231 = vmatmul.msk.bf16.vlgmr.msrb.gmra.mxu3 %vm450_vm2, %v1116_v35  ;;  %v1375_v19 = vsel %vm1349_vm4, %v1365_v58, %v1374_v16  ;;  %v1406_v21 = vrot.slane %v1404_v7, 1 }
  0x5a   : > { %3116 = vmatmul.msk.bf16.gmra.mxu1 %vm450_vm2, %v3703_v29  ;;  %v753_v29 = vrot.slane %v3471_v50, 1  ;;  %v1125_v50 = vrot.slane %v3436_v47, 1 }
  0x5b   : > { %3121 = vmatmul.msk.bf16.gmra.mxu2 %vm450_vm2, %v425_v39 }
  0x5c   : > { %3111 = vmatmul.msk.bf16.gmra.mxu0 %vm450_vm2, %v345_v55  ;;  %v754_v55 = vrot.slane %v3618_v13, 1  ;;  %v1126_v56 = vsel %vm752_vm3, %v1123_v34, %v1125_v50 }
  0x5d   : > { %3232 = vmatmul.msk.bf16.gmra.mxu3 %vm450_vm2, %v1118_v51  ;;  %v1395_v51 = vshrl.u32 %v3435_v33, 16 }
  0x5e   : > { %v755_v59 = vsel %vm752_vm3, %v753_v29, %v754_v55  ;;  %v757_v18 = vsel %vm752_vm3, %v754_v55, %v756_v14  ;;  %v1407_v14 = vshll.u32 %v3436_v47, 16  ;;  %v766_v47 = vrot.slane %v3645_v37, 1 }
  0x5f   : > { %v1397_v55 = vrot.slane %v1395_v51, 1 }
  0x61   : > { %v1401_v58 = vor.u32 %v1400_v57, %v1397_v55  ;;  %v3439_v55 = vld [vmem:[%s3600_s24 + $0x50] sm:$0xff] }
  0x6a   : > { %3125 = vmatmul.msk.bf16.vlgmr.msrb.gmra.mxu1 %vm450_vm2, %v3615_v12  ;;  %v3434_v12 = vld [vmem:[%s3600_s24 + $0x28] sm:$0xff] }
  0x6b   : > { %3144 = vmatmul.msk.bf16.vlgmr.msrb.gmra.mxu2 %vm450_vm2, %v755_v59  ;;  %v1121_v20 = vrot.slane %v3434_v12, 1  ;;  %v1386_v35 = vshrl.u32 %v3434_v12, 16  ;;  %v1389_v36 = vshll.u32 %v3434_v12, 16 }
  0x6c   : > { %3250 = vmatmul.msk.bf16.vlgmr.msrb.gmra.mxu0 %vm450_vm2, %v1366_v62 }
  0x6d   : > { %3233 = vmatmul.msk.bf16.gmra.mxu3 %vm450_vm2, %v1120_v3  ;;  %v1122_v15 = vsel %vm752_vm3, %v1119_v0, %v1121_v20  ;;  %v1124_v39 = vsel %vm752_vm3, %v1121_v20, %v1123_v34  ;;  %v1388_v41 = vrot.slane %v1386_v35, 1  ;;  %v1391_v44 = vrot.slane %v1389_v36, 2 }
  0x6e   : > { %v1413_v35 = vshrl.u32 %v3437_v1, 16  ;;  %v1416_v36 = vshll.u32 %v3437_v1, 16 }
  0x6f   : > { %v1392_v45 = vor.u32 %v1391_v44, %v1388_v41 }
  0x71   : > { %v1393_v49 = vsel %vm1349_vm4, %v1383_v30, %v1392_v45  ;;  %v1402_v3 = vsel %vm1349_vm4, %v1392_v45, %v1401_v58 }
  0x7a   : > { %3126 = vmatmul.msk.bf16.gmra.mxu1 %vm450_vm2, %v3618_v13  ;;  %v1384_v13 = vsel %vm1349_vm4, %v1374_v16, %v1383_v30 }
  0x7b   : > { %3145 = vmatmul.msk.bf16.gmra.mxu2 %vm450_vm2, %v757_v18 }
  0x7c   : > { %3251 = vmatmul.msk.bf16.gmra.mxu0 %vm450_vm2, %v1375_v19  ;;  %v1128_v19 = vsel %vm752_vm3, %v1125_v50, %v1127_v4 }
  0x7d   : > { %3234 = vmatmul.msk.bf16.gmra.mxu3 %vm450_vm2, %v1122_v15 }
  0x8a   : > { %3127 = vmatmul.msk.bf16.gmra.mxu1 %vm450_vm2, %v3654_v42  ;;  %v761_v42 = vsel %vm752_vm3, %v758_v28, %v760_v24 }
  0x8b   : > { %3146 = vmatmul.msk.bf16.gmra.mxu2 %vm450_vm2, %v759_v32  ;;  %v3438_v32 = vld [vmem:[%s3600_s24 + $0x48] sm:$0xff] }
  0x8c   : > { %3252 = vmatmul.msk.bf16.gmra.mxu0 %vm450_vm2, %v1384_v13  ;;  %v1129_v34 = vrot.slane %v3438_v32, 1  ;;  %v1425_v1 = vshll.u32 %v3438_v32, 16 }
  0x8d   : > { %3235 = vmatmul.msk.bf16.gmra.mxu3 %vm450_vm2, %v1124_v39 }
  0x97   : > { %v3805_v46 = vpop.f32.mrf.mxu1 }
  0x99   : > { %v3809_v48 = vpop.f32.mrf.mxu0 }
  0x9a   : > { %3128 = vmatmul.msk.bf16.gmra.mxu1 %vm450_vm2, %v3690_v17  ;;  %v762_v17 = vrot.slane %v3603_v8, 1 }
  0x9b   : > { %3147 = vmatmul.msk.bf16.gmra.mxu2 %vm450_vm2, %v761_v42  ;;  %v1415_v42 = vrot.slane %v1413_v35, 1  ;;  %v3440_v35 = vld [vmem:[%s3600_s24 + $0x58] sm:$0xff] }
  0x9c   : > { %3253 = vmatmul.msk.bf16.gmra.mxu0 %vm450_vm2, %v1393_v49  ;;  %v763_v0 = vsel %vm752_vm3, %v760_v24, %v762_v17  ;;  %v765_v30 = vsel %vm752_vm3, %v762_v17, %v764_v23  ;;  %v1130_v24 = vsel %vm752_vm3, %v1127_v4, %v1129_v34 }
  0x9d   : > { %3236 = vmatmul.msk.bf16.gmra.mxu3 %vm450_vm2, %v1126_v56  ;;  %v767_v56 = vsel %vm752_vm3, %v764_v23, %v766_v47 }
  0x9e   : > { %v3816_v53 = vpop.f32.mrf.mxu2 }
  0x9f   : > { %v3818_v54 = vpop.f32.mrf.mxu1 }
  0xa0   : > { %v3827_v61 = vpop.f32.mrf.mxu3 }
  0xa1   : > { %v3821_v29 = vpop.f32.mrf.mxu0  ;;  %4561 = vst [vmem:[#allocation2_spill] sm:$0xff] %v3827_v61 }
  0xa6   : > { %v3825_v59 = vpop.f32.mrf.mxu2 }
  0xa7   : > { %v3829_v62 = vpop.f32.mrf.mxu1 }
  0xa8   : > { %v3842_v18 = vpop.f32.mrf.mxu3 }
  0xa9   : > { %v3833_v2 = vpop.f32.mrf.mxu0  ;;  %4562 = vst [vmem:[#allocation3_spill] sm:$0xff] %v3842_v18 }
  0xaa   : > { %3129 = vmatmul.msk.bf16.gmra.mxu1 %vm450_vm2, %v3699_v27  ;;  %v1409_v27 = vrot.slane %v1407_v14, 2 }
  0xab   : > { %3148 = vmatmul.msk.bf16.gmra.mxu2 %vm450_vm2, %v763_v0  ;;  %v1422_v0 = vshrl.u32 %v3438_v32, 16 }
  0xac   : > { %3254 = vmatmul.msk.bf16.gmra.mxu0 %vm450_vm2, %v1402_v3  ;;  %v1410_v15 = vor.u32 %v1409_v27, %v1406_v21  ;;  %v768_v27 = vrot.slane %v3682_v5, 1 }
  0xad   : > { %3237 = vmatmul.msk.bf16.gmra.mxu3 %vm450_vm2, %v1128_v19  ;;  %v1424_v21 = vrot.slane %v1422_v0, 1 }
  0xae   : > { %v3840_v16 = vpop.f32.mrf.mxu2  ;;  %v1411_v13 = vsel %vm1349_vm4, %v1401_v58, %v1410_v15  ;;  %v1131_v58 = vrot.slane %v3439_v55, 1 }
  0xaf   : > { %v3844_v12 = vpop.f32.mrf.mxu1 }
  0xb0   : > { %v3853_v26 = vpop.f32.mrf.mxu3  ;;  %v1132_v14 = vsel %vm752_vm3, %v1129_v34, %v1131_v58 }
  0xb1   : > { %v3847_v20 = vpop.f32.mrf.mxu0  ;;  %4563 = vst [vmem:[#allocation4_spill] sm:$0xff] %v3853_v26 }
  0xb6   : > { %v3851_v25 = vpop.f32.mrf.mxu2 }
  0xb7   : > { %v3855_v28 = vpop.f32.mrf.mxu1 }
  0xb8   : > { %v3868_v41 = vpop.f32.mrf.mxu3 }
  0xb9   : > { %v3859_v33 = vpop.f32.mrf.mxu0  ;;  %4564 = vst [vmem:[#allocation5_spill] sm:$0xff] %v3868_v41 }
  0xba   : > { %3130 = vmatmul.msk.bf16.gmra.mxu1 %vm450_vm2, %v3603_v8  ;;  %v1418_v8 = vrot.slane %v1416_v36, 2 }
  0xbb   : > { %3149 = vmatmul.msk.bf16.gmra.mxu2 %vm450_vm2, %v765_v30 }
  0xbc   : > { %3255 = vmatmul.msk.bf16.gmra.mxu0 %vm450_vm2, %v1411_v13  ;;  %v1419_v49 = vor.u32 %v1418_v8, %v1415_v42  ;;  %v769_v13 = vsel %vm752_vm3, %v766_v47, %v768_v27  ;;  %v1431_v42 = vshrl.u32 %v3439_v55, 16  ;;  %v1434_v8 = vshll.u32 %v3439_v55, 16 }
  0xbd   : > { %3238 = vmatmul.msk.bf16.gmra.mxu3 %vm450_vm2, %v1130_v24  ;;  %v1133_v24 = vrot.slane %v3440_v35, 1 }
  0xbe   : > { %v3866_v39 = vpop.f32.mrf.mxu2  ;;  %v1420_v17 = vsel %vm1349_vm4, %v1410_v15, %v1419_v49 }
  0xbf   : > { %v3870_v44 = vpop.f32.mrf.mxu1  ;;  %v1134_v0 = vsel %vm752_vm3, %v1131_v58, %v1133_v24  ;;  %v1135_v58 = vrot.slane %v3441_v22, 1 }
  0xc0   : > { %v3879_v51 = vpop.f32.mrf.mxu3 }
  0xc1   : > { %v3873_v45 = vpop.f32.mrf.mxu0  ;;  %4565 = vst [vmem:[#allocation6_spill] sm:$0xff] %v3879_v51  ;;  %v1136_v26 = vsel %vm752_vm3, %v1133_v24, %v1135_v58  ;;  %v3442_v24 = vld [vmem:[%s3600_s24 + $0x68] sm:$0xff] }
  0xc6   : > { %v3877_v50 = vpop.f32.mrf.mxu2 }
  0xc7   : > { %v3881_v43 = vpop.f32.mrf.mxu1 }
  0xc8   : > { %v3894_v4 = vpop.f32.mrf.mxu3 }
  0xc9   : > { %v3885_v57 = vpop.f32.mrf.mxu0  ;;  %4566 = vst [vmem:[#allocation7_spill] sm:$0xff] %v3894_v4 }
  0xca   : > { %3131 = vmatmul.msk.bf16.gmra.mxu1 %vm450_vm2, %v3606_v9  ;;  %v1427_v9 = vrot.slane %v1425_v1, 2 }
  0xcb   : > { %3150 = vmatmul.msk.bf16.gmra.mxu2 %vm450_vm2, %v767_v56 }
  0xcc   : > { %3256 = vmatmul.msk.bf16.gmra.mxu0 %vm450_vm2, %v1420_v17  ;;  %v1428_v23 = vor.u32 %v1427_v9, %v1424_v21 }
  0xcd   : > { %3239 = vmatmul.msk.bf16.gmra.mxu3 %vm450_vm2, %v1132_v14  ;;  %v1436_v14 = vrot.slane %v1434_v8, 2  ;;  %v1440_v8 = vshrl.u32 %v3440_v35, 16 }
  0xce   : > { %v3892_v3 = vpop.f32.mrf.mxu2  ;;  %v1429_v34 = vsel %vm1349_vm4, %v1419_v49, %v1428_v23  ;;  %v1433_v49 = vrot.slane %v1431_v42, 1 }
  0xcf   : > { %v3896_v7 = vpop.f32.mrf.mxu1  ;;  %v1442_v61 = vrot.slane %v1440_v8, 1 }
  0xd0   : > { %v1217_v30 = vpop.f32.mrf.mxu3  ;;  %v1437_v21 = vor.u32 %v1436_v14, %v1433_v49 }
  0xd1   : > { %v3899_v19 = vpop.f32.mrf.mxu0 }
  0xd2   : > { %v1438_v51 = vsel %vm1349_vm4, %v1428_v23, %v1437_v21 }
  0xd6   : > { %v3903_v15 = vpop.f32.mrf.mxu2 }
  0xd7   : > { %v3905_v32 = vpop.f32.mrf.mxu1 }
  0xd8   : > { %v1219_v17 = vpop.f32.mrf.mxu3 }
  0xd9   : > { %v3909_v36 = vpop.f32.mrf.mxu0 }
  0xda   : > { %3132 = vmatmul.msk.bf16.gmra.mxu1 %vm450_vm2, %v3645_v37  ;;  %v770_v37 = vrot.slane %v3673_v60, 1 }
  0xdb   : > { %3151 = vmatmul.msk.bf16.gmra.mxu2 %vm450_vm2, %v769_v13 }
  0xdc   : > { %3257 = vmatmul.msk.bf16.gmra.mxu0 %vm450_vm2, %v1429_v34  ;;  %v771_v34 = vsel %vm752_vm3, %v768_v27, %v770_v37 }
  0xdd   : > { %3240 = vmatmul.msk.bf16.gmra.mxu3 %vm450_vm2, %v1134_v0  ;;  %v1443_v0 = vshll.u32 %v3440_v35, 16 }
  0xde   : > { %v3916_v56 = vpop.f32.mrf.mxu2 }
  0xdf   : > { %4567 = vst [vmem:[#allocation8_spill] sm:$0xff] %v3916_v56  ;;  %v3918_v47 = vpop.f32.mrf.mxu1 }
  0xe0   : > { %v1222_v13 = vpop.f32.mrf.mxu3 }
  0xe1   : > { %v3921_v1 = vpop.f32.mrf.mxu0 }
  0xe6   : > { %v3925_v9 = vpop.f32.mrf.mxu2 }
  0xe7   : > { %4568 = vst [vmem:[#allocation9_spill] sm:$0xff] %v3925_v9  ;;  %v656_v55 = vpop.f32.mrf.mxu1 }
  0xe8   : > { %v657_v42 = vadd.f32 %v656_v55, %v3809_v48  ;;  %v1224_v14 = vpop.f32.mrf.mxu3 }
  0xe9   : > { %v1586_v4 = vpop.f32.mrf.mxu0 }
  0xea   : > { %3133 = vmatmul.msk.bf16.gmra.mxu1 %vm450_vm2, %v3682_v5  ;;  %v1445_v5 = vrot.slane %v1443_v0, 2  ;;  %v1452_v0 = vshll.u32 %v3441_v22, 16 }
  0xeb   : > { %3152 = vmatmul.msk.bf16.gmra.mxu2 %vm450_vm2, %v771_v34 }
  0xec   : > { %3258 = vmatmul.msk.bf16.gmra.mxu0 %vm450_vm2, %v1438_v51  ;;  %v772_v51 = vrot.slane %v3609_v10, 1  ;;  %v1446_v35 = vor.u32 %v1445_v5, %v1442_v61 }
  0xed   : > { %3241 = vmatmul.msk.bf16.gmra.mxu3 %vm450_vm2, %v1136_v26 }
  0xee   : > { %v856_v49 = vpop.f32.mrf.mxu2  ;;  %v773_v56 = vsel %vm752_vm3, %v770_v37, %v772_v51  ;;  %v1447_v8 = vsel %vm1349_vm4, %v1437_v21, %v1446_v35 }
  0xef   : > { %v946_v41 = vadd.f32 %v856_v49, %v657_v42  ;;  %v658_v27 = vpop.f32.mrf.mxu1 }
  0xf0   : > { %v659_v48 = vadd.f32 %v658_v27, %v3821_v29  ;;  %v1227_v9 = vpop.f32.mrf.mxu3  ;;  %v1137_v29 = vrot.slane %v3442_v24, 1 }
  0xf1   : > { %v1307_v23 = vadd.f32 %v1217_v30, %v946_v41  ;;  %v1588_v18 = vpop.f32.mrf.mxu0 }
  0xf2   : > { %v1138_v21 = vsel %vm752_vm3, %v1135_v58, %v1137_v29  ;;  %v3443_v58 = vld [vmem:[%s3600_s24 + $0x70] sm:$0xff] }
  0xf3   : > { %v3937_v34 = vadd.f32 %v1586_v4, %v1307_v23  ;;  %v1449_v4 = vshrl.u32 %v3441_v22, 16 }
  0xf6   : > { %v858_v55 = vpop.f32.mrf.mxu2 }
  0xf7   : > { %v947_v42 = vadd.f32 %v858_v55, %v659_v48  ;;  %v661_v49 = vpop.f32.mrf.mxu1  ;;  %v1451_v48 = vrot.slane %v1449_v4, 1  ;;  %v774_v55 = vrot.slane %v3612_v11, 1 }
  0xf8   : > { %v662_v61 = vadd.f32 %v661_v49, %v3833_v2  ;;  %v1229_v27 = vpop.f32.mrf.mxu3 }
  0xf9   : > { %v1308_v41 = vadd.f32 %v1219_v17, %v947_v42  ;;  %v1591_v30 = vpop.f32.mrf.mxu0 }
  0xfa   : > { %3134 = vmatmul.msk.bf16.gmra.mxu1 %vm450_vm2, %v3673_v60 }
  0xfb   : > { %3153 = vmatmul.msk.bf16.gmra.mxu2 %vm450_vm2, %v773_v56  ;;  %v3947_v26 = vadd.f32 %v1588_v18, %v1308_v41  ;;  %v1454_v56 = vrot.slane %v1452_v0, 2 }
  0xfc   : > { %3259 = vmatmul.msk.bf16.gmra.mxu0 %vm450_vm2, %v1447_v8 }
  0xfd   : > { %3242 = vmatmul.msk.bf16.gmra.mxu3 %vm450_vm2, %v1138_v21  ;;  %v1455_v22 = vor.u32 %v1454_v56, %v1451_v48 }
  0xfe   : > { %v861_v37 = vpop.f32.mrf.mxu2 }
  0xff   : > { %v948_v17 = vadd.f32 %v861_v37, %v662_v61  ;;  %v663_v23 = vpop.f32.mrf.mxu1  ;;  %v775_v61 = vsel %vm752_vm3, %v772_v51, %v774_v55  ;;  %v1456_v4 = vsel %vm1349_vm4, %v1446_v35, %v1455_v22 }
 0x100   : > { %v664_v2 = vadd.f32 %v663_v23, %v3847_v20  ;;  %v1232_v49 = vpop.f32.mrf.mxu3  ;;  %v1139_v20 = vrot.slane %v3443_v58, 1  ;;  %v1461_v23 = vshll.u32 %v3442_v24, 16 }
 0x101   : > { %v1309_v5 = vadd.f32 %v1222_v13, %v948_v17  ;;  %v1593_v60 = vpop.f32.mrf.mxu0  ;;  %v1458_v17 = vshrl.u32 %v3442_v24, 16 }
 0x102   : > { %v1140_v35 = vsel %vm752_vm3, %v1137_v29, %v1139_v20  ;;  %v3444_v29 = vld [vmem:[%s3600_s24 + $0x78] sm:$0xff] }
 0x103   : > { %v3953_v18 = vadd.f32 %v1591_v30, %v1309_v5  ;;  %v1460_v56 = vrot.slane %v1458_v17, 1 }
 0x106   : > { %v863_v42 = vpop.f32.mrf.mxu2 }
 0x107   : > { %v949_v41 = vadd.f32 %v863_v42, %v664_v2  ;;  %v666_v8 = vpop.f32.mrf.mxu1  ;;  %v1463_v2 = vrot.slane %v1461_v23, 2  ;;  %v776_v42 = vrot.slane %v3649_v38, 1 }
 0x108   : > { %v667_v0 = vadd.f32 %v666_v8, %v3859_v33  ;;  %v1234_v21 = vpop.f32.mrf.mxu3 }
 0x109   : > { %v1310_v13 = vadd.f32 %v1224_v14, %v949_v41  ;;  %v1596_v37 = vpop.f32.mrf.mxu0  ;;  %v1464_v24 = vor.u32 %v1463_v2, %v1460_v56 }
 0x10a   : > { %3135 = vmatmul.msk.bf16.gmra.mxu1 %vm450_vm2, %v3609_v10 }
 0x10b   : > { %3154 = vmatmul.msk.bf16.gmra.mxu2 %vm450_vm2, %v775_v61  ;;  %v3963_v30 = vadd.f32 %v1593_v60, %v1310_v13  ;;  %v1465_v17 = vsel %vm1349_vm4, %v1455_v22, %v1464_v24 }
 0x10c   : > { %3260 = vmatmul.msk.bf16.gmra.mxu0 %vm450_vm2, %v1456_v4  ;;  %v777_v4 = vsel %vm752_vm3, %v774_v55, %v776_v42 }
 0x10d   : > { %3243 = vmatmul.msk.bf16.gmra.mxu3 %vm450_vm2, %v1140_v35 }
 0x10e   : > { %v866_v51 = vpop.f32.mrf.mxu2 }
 0x10f   : > { %v950_v14 = vadd.f32 %v866_v51, %v667_v0  ;;  %v668_v5 = vpop.f32.mrf.mxu1  ;;  %v1467_v51 = vshrl.u32 %v3443_v58, 16 }
 0x110   : > { %v669_v33 = vadd.f32 %v668_v5, %v3873_v45  ;;  %v1237_v8 = vpop.f32.mrf.mxu3  ;;  %v1141_v45 = vrot.slane %v3444_v29, 1 }
 0x111   : > { %v1311_v48 = vadd.f32 %v1227_v9, %v950_v14  ;;  %v1598_v10 = vpop.f32.mrf.mxu0  ;;  %v1470_v14 = vshll.u32 %v3443_v58, 16  ;;  %v1469_v56 = vrot.slane %v1467_v51, 1 }
 0x112   : > { %v1142_v22 = vsel %vm752_vm3, %v1139_v20, %v1141_v45  ;;  %v3445_v20 = vld [vmem:[%s3600_s24 + $0x80] sm:$0xff] }
 0x113   : > { %v3969_v60 = vadd.f32 %v1596_v37, %v1311_v48  ;;  %v1472_v2 = vrot.slane %v1470_v14, 2  ;;  %v1476_v14 = vshrl.u32 %v3444_v29, 16 }
 0x115   : > { %v1473_v58 = vor.u32 %v1472_v2, %v1469_v56  ;;  %v780_v2 = vrot.slane %v3720_v52, 1 }
 0x116   : > { %v868_v41 = vpop.f32.mrf.mxu2 }
 0x117   : > { %v951_v61 = vadd.f32 %v868_v41, %v669_v33  ;;  %v671_v13 = vpop.f32.mrf.mxu1  ;;  %v778_v33 = vrot.slane %v3685_v6, 1 }
 0x118   : > { %v672_v23 = vadd.f32 %v671_v13, %v3885_v57  ;;  %v1239_v5 = vpop.f32.mrf.mxu3 }
 0x119   : > { %v1312_v9 = vadd.f32 %v1229_v27, %v951_v61  ;;  %v1601_v0 = vpop.f32.mrf.mxu0 }
 0x11a   : > { %3136 = vmatmul.msk.bf16.gmra.mxu1 %vm450_vm2, %v3612_v11 }
 0x11b   : > { %3155 = vmatmul.msk.bf16.gmra.mxu2 %vm450_vm2, %v777_v4  ;;  %v3979_v37 = vadd.f32 %v1598_v10, %v1312_v9  ;;  %v779_v9 = vsel %vm752_vm3, %v776_v42, %v778_v33 }
 0x11c   : > { %3261 = vmatmul.msk.bf16.gmra.mxu0 %vm450_vm2, %v1465_v17 }
 0x11d   : > { %3244 = vmatmul.msk.bf16.gmra.mxu3 %vm450_vm2, %v1142_v22 }
 0x11e   : > { %v871_v55 = vpop.f32.mrf.mxu2 }
 0x11f   : > { %v952_v27 = vadd.f32 %v871_v55, %v672_v23  ;;  %v673_v35 = vpop.f32.mrf.mxu1  ;;  %v1474_v23 = vsel %vm1349_vm4, %v1464_v24, %v1473_v58  ;;  %v1479_v55 = vshll.u32 %v3444_v29, 16 }
 0x120   : > { %v674_v57 = vadd.f32 %v673_v35, %v3899_v19  ;;  %v1242_v61 = vpop.f32.mrf.mxu3  ;;  %v1143_v19 = vrot.slane %v3445_v20, 1 }
 0x121   : > { %v1313_v48 = vadd.f32 %v1232_v49, %v952_v27  ;;  %v1603_v11 = vpop.f32.mrf.mxu0  ;;  %v1481_v56 = vrot.slane %v1479_v55, 2  ;;  %v1488_v55 = vshll.u32 %v3445_v20, 16 }
 0x122   : > { %v1144_v24 = vsel %vm752_vm3, %v1141_v45, %v1143_v19  ;;  %v3446_v45 = vld [vmem:[%s3600_s24 + $0x88] sm:$0xff] }
 0x123   : > { %v3985_v10 = vadd.f32 %v1601_v0, %v1313_v48  ;;  %v1478_v48 = vrot.slane %v1476_v14, 1  ;;  %v1485_v14 = vshrl.u32 %v3445_v20, 16 }
 0x125   : > { %v1482_v29 = vor.u32 %v1481_v56, %v1478_v48  ;;  %v782_v48 = vrot.slane %v3636_v31, 1 }
 0x126   : > { %v873_v41 = vpop.f32.mrf.mxu2 }
 0x127   : > { %v953_v13 = vadd.f32 %v873_v41, %v674_v57  ;;  %v676_v4 = vpop.f32.mrf.mxu1 }
 0x128   : > { %v677_v51 = vadd.f32 %v676_v4, %v3909_v36  ;;  %v1244_v27 = vpop.f32.mrf.mxu3 }
 0x129   : > { %v1314_v49 = vadd.f32 %v1234_v21, %v953_v13  ;;  %v1606_v17 = vpop.f32.mrf.mxu0 }
 0x12a   : > { %3137 = vmatmul.msk.bf16.gmra.mxu1 %vm450_vm2, %v3649_v38 }
 0x12b   : > { %3156 = vmatmul.msk.bf16.gmra.mxu2 %vm450_vm2, %v779_v9  ;;  %v3995_v0 = vadd.f32 %v1603_v11, %v1314_v49  ;;  %v781_v9 = vsel %vm752_vm3, %v778_v33, %v780_v2 }
 0x12c   : > { %3262 = vmatmul.msk.bf16.gmra.mxu0 %vm450_vm2, %v1474_v23  ;;  %v1483_v23 = vsel %vm1349_vm4, %v1473_v58, %v1482_v29 }
 0x12d   : > { %3245 = vmatmul.msk.bf16.gmra.mxu3 %vm450_vm2, %v1144_v24  ;;  %v1487_v24 = vrot.slane %v1485_v14, 1 }
 0x12e   : > { %v876_v42 = vpop.f32.mrf.mxu2 }
 0x12f   : > { %v954_v21 = vadd.f32 %v876_v42, %v677_v51  ;;  %v678_v35 = vpop.f32.mrf.mxu1 }
 0x130   : > { %v679_v36 = vadd.f32 %v678_v35, %v3921_v1  ;;  %v1247_v41 = vpop.f32.mrf.mxu3  ;;  %v1145_v1 = vrot.slane %v3446_v45, 1 }
 0x131   : > { %v1315_v22 = vadd.f32 %v1237_v8, %v954_v21  ;;  %v1608_v38 = vpop.f32.mrf.mxu0 }
 0x132   : > { %v1146_v58 = vsel %vm752_vm3, %v1143_v19, %v1145_v1  ;;  %v3447_v19 = vld [vmem:[%s3600_s24 + $0x90] sm:$0xff] }
 0x133   : > { %v4001_v11 = vadd.f32 %v1606_v17, %v1315_v22  ;;  %v1490_v22 = vrot.slane %v1488_v55, 2 }
 0x135   : > { %v1491_v20 = vor.u32 %v1490_v22, %v1487_v24 }
 0x136   : > { %v878_v57 = vpop.f32.mrf.mxu2 }
 0x137   : > { %v955_v13 = vadd.f32 %v878_v57, %v679_v36  ;;  %v681_v4 = vpop.f32.mrf.mxu1 }
 0x138   : > { %v682_v51 = vadd.f32 %v681_v4, %v3805_v46  ;;  %v1249_v42 = vpop.f32.mrf.mxu3  ;;  %v783_v4 = vsel %vm752_vm3, %v780_v2, %v782_v48  ;;  %v1494_v2 = vshrl.u32 %v3446_v45, 16 }
 0x139   : > { %v1316_v8 = vadd.f32 %v1239_v5, %v955_v13  ;;  %v1611_v49 = vpop.f32.mrf.mxu0 }
 0x13a   : > { %3138 = vmatmul.msk.bf16.gmra.mxu1 %vm450_vm2, %v3685_v6 }
 0x13b   : > { %3157 = vmatmul.msk.bf16.gmra.mxu2 %vm450_vm2, %v781_v9  ;;  %v4011_v17 = vadd.f32 %v1608_v38, %v1316_v8  ;;  %v1492_v8 = vsel %vm1349_vm4, %v1482_v29, %v1491_v20 }
 0x13c   : > { %3263 = vmatmul.msk.bf16.gmra.mxu0 %vm450_vm2, %v1483_v23  ;;  %v1497_v23 = vshll.u32 %v3446_v45, 16 }
 0x13d   : > { %3246 = vmatmul.msk.bf16.gmra.mxu3 %vm450_vm2, %v1146_v58  ;;  %v1018_v58 = vld [vmem:[%s3600_s24 + $0x98] sm:$0x1] }
 0x13e   : > { %v881_v33 = vpop.f32.mrf.mxu2 }
 0x13f   : > { %v956_v5 = vadd.f32 %v881_v33, %v682_v51  ;;  %v683_v21 = vpop.f32.mrf.mxu1 }
 0x140   : > { %v684_v46 = vadd.f32 %v683_v21, %v3818_v54  ;;  %v1252_v36 = vpop.f32.mrf.mxu3  ;;  %v1147_v54 = vrot.slane %v3447_v19, 1  ;;  %v1499_v21 = vrot.slane %v1497_v23, 2 }
 0x141   : > { %v1317_v35 = vadd.f32 %v1242_v61, %v956_v5  ;;  %v1613_v6 = vpop.f32.mrf.mxu0  ;;  %v1496_v5 = vrot.slane %v1494_v2, 1  ;;  %v3502_v2 = vld [vmem:[%s3600_s24 + $0x78] sm:$0xff] }
 0x143   : > { %v4017_v38 = vadd.f32 %v1611_v49, %v1317_v35 }
 0x146   : > { %v883_v56 = vpop.f32.mrf.mxu2 }
 0x147   : > { %v957_v57 = vadd.f32 %v883_v56, %v684_v46  ;;  %v686_v13 = vpop.f32.mrf.mxu1 }
 0x148   : > { %v687_v49 = vadd.f32 %v686_v13, %v3829_v62  ;;  %v4031_v51 = vpop.f32.mrf.mxu3  ;;  %v4039_v62 = vld [vmem:[%s3600_s24 + $0x80] sm:$0xff] }
 0x149   : > { %v1318_v61 = vadd.f32 %v1244_v27, %v957_v57  ;;  %v1616_v9 = vpop.f32.mrf.mxu0  ;;  %v784_v45 = vrot.slane %v4039_v62, 1 }
 0x14a   : > { %3139 = vmatmul.msk.bf16.gmra.mxu1 %vm450_vm2, %v3720_v52  ;;  %v1148_v52 = vsel %vm752_vm3, %v1145_v1, %v1147_v54  ;;  %v1500_v1 = vor.u32 %v1499_v21, %v1496_v5  ;;  %v4063_v21 = vld [vmem:[%s3600_s24 + $0x18] sm:$0xff] }
 0x14b   : > { %3158 = vmatmul.msk.bf16.gmra.mxu2 %vm450_vm2, %v783_v4  ;;  %v4027_v31 = vadd.f32 %v1613_v6, %v1318_v61  ;;  %v1094_v6 = vunpack.c.l.b16 %v1018_v58  ;;  %v785_v57 = vsel %vm752_vm3, %v782_v48, %v784_v45 }
 0x14c   : > { %3264 = vmatmul.msk.bf16.gmra.mxu0 %vm450_vm2, %v1492_v8  ;;  %v1948_v8 = vld [vmem:[%s3600_s24 + $0x10] sm:$0xc] }
 0x14d   : > { %3247 = vmatmul.msk.bf16.gmra.mxu3 %vm450_vm2, %v1148_v52  ;;  %v1113_v13 = vpack.c.b16 %v1094_v6, %v1094_v6  ;;  %v2024_v48 = vunpack.c.l.b16 %v1948_v8 }
 0x14e   : > { %v886_v27 = vpop.f32.mrf.mxu2 }
 0x14f   : > { %v958_v29 = vadd.f32 %v886_v27, %v687_v49  ;;  %v688_v14 = vpop.f32.mrf.mxu1  ;;  %v4049_v49 = vld [vmem:[%s3600_s24 + $0x14] sm:$0xf]  ;;  %v1149_v23 = vrot.slane %v1113_v13, 1  ;;  %v1503_v27 = vshrl.u32 %v3447_v19, 16 }
 0x150   : > { %v689_v24 = vadd.f32 %v688_v14, %v3844_v12  ;;  %v4043_v22 = vpop.f32.mrf.mxu3 }
 0x151   : > { %v1319_v55 = vadd.f32 %v1247_v41, %v958_v29  ;;  %v1618_v33 = vpop.f32.mrf.mxu0  ;;  %v1506_v29 = vshll.u32 %v3447_v19, 16 }
 0x153   : > { %v4036_v35 = vadd.f32 %v1616_v9, %v1319_v55  ;;  %v1501_v9 = vsel %vm1349_vm4, %v1491_v20, %v1500_v1 }
 0x156   : > { %v888_v41 = vpop.f32.mrf.mxu2 }
 0x157   : > { %v959_v46 = vadd.f32 %v888_v41, %v689_v24  ;;  %v691_v56 = vpop.f32.mrf.mxu1  ;;  %v1505_v41 = vrot.slane %v1503_v27, 1 }
 0x158   : > { %v692_v20 = vadd.f32 %v691_v56, %v3855_v28  ;;  %v4059_v52 = vpop.f32.mrf.mxu3  ;;  %v1343_v28 = vld [vmem:[%s3600_s24 + $0x98] sm:$0x3]  ;;  %v4071_v56 = vld [vmem:[%s3600_s24 + $0x88] sm:$0xff] }
 0x159   : > { %v1320_v4 = vadd.f32 %v1249_v42, %v959_v46  ;;  %v1621_v61 = vpop.f32.mrf.mxu0  ;;  %v4560_v42 = vunpack.c.l.b16 %v4049_v49  ;;  %v1508_v46 = vrot.slane %v1506_v29, 2  ;;  %v786_v19 = vrot.slane %v4071_v56, 1 }
 0x15a   : > { %3140 = vmatmul.msk.bf16.gmra.mxu1 %vm450_vm2, %v3502_v2  ;;  %v1347_v2 = vunpack.c.l.b16 %v1343_v28 }
 0x15b   : > { %3159 = vmatmul.msk.bf16.gmra.mxu2 %vm450_vm2, %v785_v57  ;;  %v4054_v12 = vadd.f32 %v1618_v33, %v1320_v4  ;;  %v1150_v33 = vsel %vm752_vm3, %v1147_v54, %v1149_v23  ;;  %v4067_v58 = vpack.c.b16 %v4560_v42, %v2024_v48  ;;  %v2325_v4 = vshrl.u32 %v4063_v21, 16 }
 0x15c   : > { %3265 = vmatmul.msk.bf16.gmra.mxu0 %vm450_vm2, %v1501_v9  ;;  %v1509_v8 = vor.u32 %v1508_v46, %v1505_v41  ;;  %v787_v27 = vsel %vm752_vm3, %v784_v45, %v786_v19 }
 0x15d   : > { %4569 = vst [vmem:[#allocation10_spill] sm:$0xff] %v4054_v12  ;;  %3248 = vmatmul.msk.bf16.gmra.mxu3 %vm450_vm2, %v1150_v33  ;;  %v2317_v54 = vshrl.u32 %v4067_v58, 16  ;;  %v2320_v13 = vshll.u32 %v4067_v58, 16  ;;  %v4087_v12 = vpack.c.b16 %v1347_v2, %v1347_v2  ;;  %v788_v2 = vrot.slane %v3709_v40, 1 }
 0x15e   : > { %v891_v14 = vpop.f32.mrf.mxu2 }
 0x15f   : > { %v960_v55 = vadd.f32 %v891_v14, %v692_v20  ;;  %v693_v5 = vpop.f32.mrf.mxu1  ;;  %v2319_v29 = vrot.slane %v2317_v54, 2  ;;  %v2322_v14 = vrot.slane %v2320_v13, 3 }
 0x160   : > { %v694_v9 = vadd.f32 %v693_v5, %v3870_v44  ;;  %v4082_v48 = vpop.f32.mrf.mxu3 }
 0x161   : > { %v1321_v6 = vadd.f32 %v1252_v36, %v960_v55  ;;  %v1623_v24 = vpop.f32.mrf.mxu0  ;;  %v2328_v36 = vshll.u32 %v4063_v21, 16  ;;  %v2327_v55 = vrot.slane %v2325_v4, 2  ;;  %v2323_v45 = vor.u32 %v2322_v14, %v2319_v29 }
 0x163   : > { %v4075_v57 = vadd.f32 %v1621_v61, %v1321_v6  ;;  %v2330_v33 = vrot.slane %v2328_v36, 3 }
 0x165   : > { %4570 = vst [vmem:[#allocation11_spill] sm:$0xff] %v4075_v57  ;;  %v1510_v57 = vsel %vm1349_vm4, %v1500_v1, %v1509_v8  ;;  %v2331_v5 = vor.u32 %v2330_v33, %v2327_v55  ;;  %v1515_v1 = vshll.u32 %v4087_v12, 16  ;;  %v789_v33 = vsel %vm752_vm3, %v786_v19, %v788_v2  ;;  %v4132_v2 = vld [vmem:[%s3600_s24 + $0x28] sm:$0xff] }
 0x166   : > { %v893_v23 = vpop.f32.mrf.mxu2 }
 0x167   : > { %v961_v20 = vadd.f32 %v893_v23, %v694_v9  ;;  %v696_v61 = vpop.f32.mrf.mxu1  ;;  %v2332_v13 = vsel %vm2315_vm5, %v2323_v45, %v2331_v5 }
 0x168   : > { %v697_v41 = vadd.f32 %v696_v61, %v3881_v43  ;;  %v4098_v28 = vpop.f32.mrf.mxu3  ;;  %v1517_v43 = vrot.slane %v1515_v1, 2  ;;  %v2678_v1 = vld [vmem:[%s3600_s24 + $0x10] sm:$0x8] }
 0x169   : > { %v1322_v6 = vadd.f32 %v4031_v51, %v961_v20  ;;  %v1626_v42 = vpop.f32.mrf.mxu0  ;;  %v1512_v51 = vshrl.u32 %v4087_v12, 16 }
 0x16a   : > { %3141 = vmatmul.msk.bf16.gmra.mxu1 %vm450_vm2, %v4039_v62 }
 0x16b   : > { %3160 = vmatmul.msk.bf16.gmra.mxu2 %vm450_vm2, %v787_v27  ;;  %v4092_v44 = vadd.f32 %v1623_v24, %v1322_v6  ;;  %v4102_v24 = vld [vmem:[%s3600_s24 + $0x20] sm:$0xff]  ;;  %v1514_v36 = vrot.slane %v1512_v51, 1  ;;  %v1712_v6 = vld [vmem:[%s3600_s24 + $0x8] sm:$0xc] }
 0x16c   : > { %3266 = vmatmul.msk.bf16.gmra.mxu0 %vm450_vm2, %v1510_v57  ;;  %v2334_v23 = vshrl.u32 %v4102_v24, 16  ;;  %v2337_v20 = vshll.u32 %v4102_v24, 16 }
 0x16d   : > { %3375 = vmatmul.msk.bf16.vlgmr.msra.gmra.mxu3 %vm450_vm2, %v2332_v13  ;;  %v1518_v61 = vor.u32 %v1517_v43, %v1514_v36 }
 0x16e   : > { %v896_v46 = vpop.f32.mrf.mxu2  ;;  %v2339_v45 = vrot.slane %v2337_v20, 3  ;;  %v4572_v20 = vunpack.c.l.b16 %v4049_v49 }
 0x16f   : > { %v962_v54 = vadd.f32 %v896_v46, %v697_v41  ;;  %v698_v62 = vpop.f32.mrf.mxu1  ;;  %v1519_v51 = vsel %vm1349_vm4, %v1509_v8, %v1518_v61  ;;  %v3504_v61 = vld [vmem:[%s3600_s24 + $0x10] sm:$0xff] }
 0x170   : > { %v699_v27 = vadd.f32 %v698_v62, %v3896_v7  ;;  %v1716_v7 = vunpack.c.l.b16 %v1712_v6  ;;  %v2686_v6 = vrot.slane %v4063_v21, 3 }
 0x171   : > { %v1323_v57 = vadd.f32 %v4043_v22, %v962_v54  ;;  %v1628_v4 = vpop.f32.mrf.mxu0  ;;  %v4112_v22 = vpop.f32.mrf.mxu3 }
 0x173   : > { %v4106_v9 = vadd.f32 %v1626_v42, %v1323_v57  ;;  %v2336_v42 = vrot.slane %v2334_v23, 2  ;;  %v4571_v57 = vunpack.c.l.b16 %v3731_v63  ;;  %v2080_v63 = vrot.slane %v4067_v58, 2 }
 0x175   : > { %v2340_v19 = vor.u32 %v2339_v45, %v2336_v42  ;;  %v1717_v36 = vpack.c.b16 %v4571_v57, %v1716_v7 }
 0x176   : > { %v898_v29 = vpop.f32.mrf.mxu2 }
 0x177   : > { %v963_v14 = vadd.f32 %v898_v29, %v699_v27  ;;  %v701_v55 = vpop.f32.mrf.mxu1  ;;  %v2341_v43 = vsel %vm2315_vm5, %v2331_v5, %v2340_v19  ;;  %v1720_v29 = vrot.slane %v3504_v61, 2  ;;  %v2343_v5 = vshrl.u32 %v4132_v2, 16 }
 0x178   : > { %v702_v54 = vadd.f32 %v701_v55, %v3905_v32  ;;  %v1719_v32 = vrot.slane %v1717_v36, 2  ;;  %v2081_v55 = vrot.slane %v4063_v21, 2 }
 0x179   : > { %v1324_v40 = vadd.f32 %v4059_v52, %v963_v14  ;;  %v1631_v41 = vpop.f32.mrf.mxu0  ;;  %v2682_v52 = vunpack.c.l.b16 %v2678_v1  ;;  %v4126_v13 = vpop.f32.mrf.mxu3  ;;  %v2345_v1 = vrot.slane %v2343_v5, 2 }
 0x17a   : > { %3142 = vmatmul.msk.bf16.gmra.mxu1 %vm450_vm2, %v4071_v56  ;;  %v2082_v58 = vsel %vm1718_vm6, %v2080_v63, %v2081_v55  ;;  %v2083_v63 = vrot.slane %v4102_v24, 2 }
 0x17b   : > { %3161 = vmatmul.msk.bf16.gmra.mxu2 %vm450_vm2, %v789_v33  ;;  %v4122_v46 = vadd.f32 %v1628_v4, %v1324_v40  ;;  %v2683_v27 = vpack.c.b16 %v4572_v20, %v2682_v52  ;;  %v2346_v33 = vshll.u32 %v4132_v2, 16 }
 0x17c   : > { %3267 = vmatmul.msk.bf16.gmra.mxu0 %vm450_vm2, %v1519_v51  ;;  %v1721_v51 = vsel %vm1718_vm6, %v1719_v32, %v1720_v29  ;;  %v3505_v32 = vld [vmem:[%s3600_s24 + $0x18] sm:$0xff] }
 0x17d   : > { %3376 = vmatmul.msk.bf16.gmra.mxu3 %vm450_vm2, %v2341_v43  ;;  %v2685_v49 = vrot.slane %v2683_v27, 3  ;;  %v2348_v7 = vrot.slane %v2346_v33, 3  ;;  %v1722_v61 = vrot.slane %v3505_v32, 2 }
 0x17e   : > { %v901_v62 = vpop.f32.mrf.mxu2 }
 0x17f   : > { %v964_v8 = vadd.f32 %v901_v62, %v702_v54  ;;  %v703_v56 = vpop.f32.mrf.mxu1  ;;  %v2349_v62 = vor.u32 %v2348_v7, %v2345_v1 }
 0x181   : > { %v1325_v4 = vadd.f32 %v4082_v48, %v964_v8  ;;  %v1633_v23 = vpop.f32.mrf.mxu0  ;;  %v704_v48 = vadd.f32 %v703_v56, %v3918_v47  ;;  %v1272_v45 = vpop.f32.mrf.mxu3  ;;  %v2687_v47 = vsel %vm2684_vm7, %v2685_v49, %v2686_v6 }
 0x183   : > { %v4139_v14 = vadd.f32 %v1631_v41, %v1325_v4  ;;  %v4159_v4 = vld [vmem:[%s3600_s24 + $0x30] sm:$0xff] }
 0x184   : > { %v2355_v5 = vshll.u32 %v4159_v4, 16 }
 0x186   : > { %v903_v42 = vpop.f32.mrf.mxu2 }
 0x187   : > { %v965_v40 = vadd.f32 %v903_v42, %v704_v48  ;;  %v706_v41 = vpop.f32.mrf.mxu1 }
 0x188   : > { %v707_v8 = vadd.f32 %v706_v41, %v3816_v53  ;;  %v2352_v53 = vshrl.u32 %v4159_v4, 16  ;;  %v2084_v41 = vsel %vm1718_vm6, %v2081_v55, %v2083_v63 }
 0x189   : > { %v1326_v54 = vadd.f32 %v4098_v28, %v965_v40  ;;  %v1636_v52 = vpop.f32.mrf.mxu0  ;;  %v1274_v36 = vpop.f32.mrf.mxu3  ;;  %v2350_v28 = vsel %vm2315_vm5, %v2340_v19, %v2349_v62  ;;  %v2688_v19 = vrot.slane %v4102_v24, 3  ;;  %v1723_v40 = vsel %vm1718_vm6, %v1720_v29, %v1722_v61 }
 0x18a   : > { %3269 = vmatmul.msk.bf16.vlgmr.msra.gmra.mxu1 %vm450_vm2, %v1721_v51  ;;  %v2354_v51 = vrot.slane %v2352_v53, 2 }
 0x18b   : > { %3356 = vmatmul.msk.bf16.vlgmr.msra.gmra.mxu2 %vm450_vm2, %v2082_v58  ;;  %v4153_v21 = vadd.f32 %v1633_v23, %v1326_v54  ;;  %v2357_v58 = vrot.slane %v2355_v5, 3  ;;  %v2689_v54 = vsel %vm2684_vm7, %v2686_v6, %v2688_v19 }
 0x18c   : > { %3394 = vmatmul.msk.bf16.vlgmr.msra.gmra.mxu0 %vm450_vm2, %v2687_v47 }
 0x18d   : > { %3377 = vmatmul.msk.bf16.gmra.mxu3 %vm450_vm2, %v2350_v28  ;;  %v2358_v24 = vor.u32 %v2357_v58, %v2354_v51  ;;  %v3506_v28 = vld [vmem:[%s3600_s24 + $0x20] sm:$0xff] }
 0x18e   : > { %v906_v57 = vpop.f32.mrf.mxu2 }
 0x18f   : > { %v966_v56 = vadd.f32 %v906_v57, %v707_v8  ;;  %v708_v43 = vpop.f32.mrf.mxu1  ;;  %v4183_v57 = vld [vmem:[%s3600_s24 + $0x38] sm:$0xff] }
 0x190   : > { %v709_v33 = vadd.f32 %v708_v43, %v3825_v59  ;;  %v2364_v32 = vshll.u32 %v4183_v57, 16 }
 0x191   : > { %v1327_v20 = vadd.f32 %v4112_v22, %v966_v56  ;;  %v1638_v27 = vpop.f32.mrf.mxu0  ;;  %v1277_v49 = vpop.f32.mrf.mxu3 }
 0x193   : > { %v4163_v23 = vadd.f32 %v1636_v52, %v1327_v20  ;;  %v1724_v20 = vrot.slane %v3506_v28, 2 }
 0x196   : > { %v908_v48 = vpop.f32.mrf.mxu2 }
 0x197   : > { %v967_v22 = vadd.f32 %v908_v48, %v709_v33  ;;  %v711_v42 = vpop.f32.mrf.mxu1 }
 0x198   : > { %v712_v29 = vadd.f32 %v711_v42, %v3840_v16  ;;  %v2361_v16 = vshrl.u32 %v4183_v57, 16 }
 0x199   : > { %v1328_v1 = vadd.f32 %v4126_v13, %v967_v22  ;;  %v1641_v7 = vpop.f32.mrf.mxu0  ;;  %v1279_v52 = vpop.f32.mrf.mxu3  ;;  %v2359_v13 = vsel %vm2315_vm5, %v2349_v62, %v2358_v24  ;;  %v2690_v62 = vrot.slane %v4132_v2, 3  ;;  %v1725_v22 = vsel %vm1718_vm6, %v1722_v61, %v1724_v20 }
 0x19a   : > { %3270 = vmatmul.msk.bf16.gmra.mxu1 %vm450_vm2, %v1723_v40  ;;  %v2363_v40 = vrot.slane %v2361_v16, 2 }
 0x19b   : > { %3357 = vmatmul.msk.bf16.gmra.mxu2 %vm450_vm2, %v2084_v41  ;;  %v4177_v59 = vadd.f32 %v1638_v27, %v1328_v1  ;;  %v2085_v27 = vrot.slane %v4132_v2, 2  ;;  %v2366_v41 = vrot.slane %v2364_v32, 3  ;;  %v2691_v1 = vsel %vm2684_vm7, %v2688_v19, %v2690_v62 }
 0x19c   : > { %3395 = vmatmul.msk.bf16.gmra.mxu0 %vm450_vm2, %v2689_v54 }
 0x19d   : > { %3378 = vmatmul.msk.bf16.gmra.mxu3 %vm450_vm2, %v2359_v13  ;;  %v2086_v42 = vsel %vm1718_vm6, %v2083_v63, %v2085_v27  ;;  %v2367_v2 = vor.u32 %v2366_v41, %v2363_v40  ;;  %v3507_v13 = vld [vmem:[%s3600_s24 + $0x28] sm:$0xff] }
 0x19e   : > { %v911_v55 = vpop.f32.mrf.mxu2 }
 0x19f   : > { %v968_v47 = vadd.f32 %v911_v55, %v712_v29  ;;  %v713_v8 = vpop.f32.mrf.mxu1  ;;  %v4205_v55 = vld [vmem:[%s3600_s24 + $0x40] sm:$0xff] }
 0x1a0   : > { %v714_v53 = vadd.f32 %v713_v8, %v3851_v25  ;;  %v2373_v28 = vshll.u32 %v4205_v55, 16 }
 0x1a1   : > { %v1329_v6 = vadd.f32 %v1272_v45, %v968_v47  ;;  %v1643_v56 = vpop.f32.mrf.mxu0  ;;  %v1282_v33 = vpop.f32.mrf.mxu3 }
 0x1a3   : > { %v4186_v43 = vadd.f32 %v1641_v7, %v1329_v6  ;;  %v1726_v6 = vrot.slane %v3507_v13, 2 }
 0x1a6   : > { %v913_v5 = vpop.f32.mrf.mxu2 }
 0x1a7   : > { %v969_v45 = vadd.f32 %v913_v5, %v714_v53  ;;  %v716_v48 = vpop.f32.mrf.mxu1 }
 0x1a8   : > { %v717_v61 = vadd.f32 %v716_v48, %v3866_v39  ;;  %v2370_v39 = vshrl.u32 %v4205_v55, 16 }
 0x1a9   : > { %v1330_v51 = vadd.f32 %v1274_v36, %v969_v45  ;;  %v1646_v58 = vpop.f32.mrf.mxu0  ;;  %v1284_v7 = vpop.f32.mrf.mxu3  ;;  %v2368_v36 = vsel %vm2315_vm5, %v2358_v24, %v2367_v2  ;;  %v2692_v24 = vrot.slane %v4159_v4, 3  ;;  %v1727_v45 = vsel %vm1718_vm6, %v1724_v20, %v1726_v6 }
 0x1aa   : > { %3271 = vmatmul.msk.bf16.gmra.mxu1 %vm450_vm2, %v1725_v22  ;;  %v2372_v22 = vrot.slane %v2370_v39, 2 }
 0x1ab   : > { %3358 = vmatmul.msk.bf16.gmra.mxu2 %vm450_vm2, %v2086_v42  ;;  %v4199_v25 = vadd.f32 %v1643_v56, %v1330_v51  ;;  %v2087_v56 = vrot.slane %v4159_v4, 2  ;;  %v2375_v42 = vrot.slane %v2373_v28, 3  ;;  %v2693_v51 = vsel %vm2684_vm7, %v2690_v62, %v2692_v24 }
 0x1ac   : > { %3396 = vmatmul.msk.bf16.gmra.mxu0 %vm450_vm2, %v2691_v1 }
 0x1ad   : > { %3379 = vmatmul.msk.bf16.gmra.mxu3 %vm450_vm2, %v2368_v36  ;;  %v2088_v48 = vsel %vm1718_vm6, %v2085_v27, %v2087_v56  ;;  %v2376_v4 = vor.u32 %v2375_v42, %v2372_v22  ;;  %v3508_v36 = vld [vmem:[%s3600_s24 + $0x30] sm:$0xff] }
 0x1ae   : > { %v916_v63 = vpop.f32.mrf.mxu2 }
 0x1af   : > { %v970_v54 = vadd.f32 %v916_v63, %v717_v61  ;;  %v718_v29 = vpop.f32.mrf.mxu1  ;;  %v4227_v63 = vld [vmem:[%s3600_s24 + $0x48] sm:$0xff] }
 0x1b0   : > { %v719_v16 = vadd.f32 %v718_v29, %v3877_v50  ;;  %v2382_v13 = vshll.u32 %v4227_v63, 16 }
 0x1b1   : > { %v1331_v19 = vadd.f32 %v1277_v49, %v970_v54  ;;  %v1648_v47 = vpop.f32.mrf.mxu0  ;;  %v1287_v53 = vpop.f32.mrf.mxu3 }
 0x1b3   : > { %v4208_v8 = vadd.f32 %v1646_v58, %v1331_v19  ;;  %v1728_v19 = vrot.slane %v3508_v36, 2  ;;  %v2091_v36 = vrot.slane %v4205_v55, 2 }
 0x1b6   : > { %v918_v32 = vpop.f32.mrf.mxu2 }
 0x1b7   : > { %v971_v49 = vadd.f32 %v918_v32, %v719_v16  ;;  %v721_v5 = vpop.f32.mrf.mxu1 }
 0x1b8   : > { %v722_v20 = vadd.f32 %v721_v5, %v3892_v3  ;;  %v2379_v3 = vshrl.u32 %v4227_v63, 16 }
 0x1b9   : > { %v1332_v40 = vadd.f32 %v1279_v52, %v971_v49  ;;  %v1651_v41 = vpop.f32.mrf.mxu0  ;;  %v1289_v58 = vpop.f32.mrf.mxu3  ;;  %v2377_v52 = vsel %vm2315_vm5, %v2367_v2, %v2376_v4  ;;  %v2694_v2 = vrot.slane %v4183_v57, 3  ;;  %v1729_v49 = vsel %vm1718_vm6, %v1726_v6, %v1728_v19  ;;  %v4573_v6 = vld [vmem:[#allocation8_spill] sm:$0xff] }
 0x1ba   : > { %3272 = vmatmul.msk.bf16.gmra.mxu1 %vm450_vm2, %v1727_v45  ;;  %v2381_v45 = vrot.slane %v2379_v3, 2 }
 0x1bb   : > { %3359 = vmatmul.msk.bf16.gmra.mxu2 %vm450_vm2, %v2088_v48  ;;  %v4221_v50 = vadd.f32 %v1648_v47, %v1332_v40  ;;  %v2089_v47 = vrot.slane %v4183_v57, 2  ;;  %v2384_v48 = vrot.slane %v2382_v13, 3  ;;  %v2695_v40 = vsel %vm2684_vm7, %v2692_v24, %v2694_v2 }
 0x1bc   : > { %3397 = vmatmul.msk.bf16.gmra.mxu0 %vm450_vm2, %v2693_v51 }
 0x1bd   : > { %3380 = vmatmul.msk.bf16.gmra.mxu3 %vm450_vm2, %v2377_v52  ;;  %v2090_v5 = vsel %vm1718_vm6, %v2087_v56, %v2089_v47  ;;  %v2385_v57 = vor.u32 %v2384_v48, %v2381_v45  ;;  %v2092_v45 = vsel %vm1718_vm6, %v2089_v47, %v2091_v36 }
 0x1be   : > { %v921_v27 = vpop.f32.mrf.mxu2 }
 0x1bf   : > { %v972_v1 = vadd.f32 %v921_v27, %v722_v20  ;;  %v723_v61 = vpop.f32.mrf.mxu1 }
 0x1c0   : > { %v724_v39 = vadd.f32 %v723_v61, %v3903_v15 }
 0x1c1   : > { %v1333_v62 = vadd.f32 %v1282_v33, %v972_v1  ;;  %v1653_v54 = vpop.f32.mrf.mxu0  ;;  %v1292_v16 = vpop.f32.mrf.mxu3  ;;  %v4249_v1 = vld [vmem:[%s3600_s24 + $0x50] sm:$0xff] }
 0x1c2   : > { %v2388_v3 = vshrl.u32 %v4249_v1, 16  ;;  %v2391_v13 = vshll.u32 %v4249_v1, 16 }
 0x1c3   : > { %v4230_v29 = vadd.f32 %v1651_v41, %v1333_v62  ;;  %v3509_v62 = vld [vmem:[%s3600_s24 + $0x38] sm:$0xff] }
 0x1c4   : > { %v2390_v48 = vrot.slane %v2388_v3, 2 }
 0x1c6   : > { %v923_v28 = vpop.f32.mrf.mxu2 }
 0x1c7   : > { %v973_v33 = vadd.f32 %v923_v28, %v724_v39  ;;  %v726_v32 = vpop.f32.mrf.mxu1  ;;  %v4574_v39 = vld [vmem:[#allocation9_spill] sm:$0xff] }
 0x1c8   : > { %v727_v41 = vadd.f32 %v726_v32, %v4573_v6 }
 0x1c9   : > { %v1334_v22 = vadd.f32 %v1284_v7, %v973_v33  ;;  %v1656_v42 = vpop.f32.mrf.mxu0  ;;  %v1294_v51 = vpop.f32.mrf.mxu3  ;;  %v2386_v7 = vsel %vm2315_vm5, %v2376_v4, %v2385_v57  ;;  %v2696_v4 = vrot.slane %v4205_v55, 3 }
 0x1ca   : > { %3273 = vmatmul.msk.bf16.gmra.mxu1 %vm450_vm2, %v1729_v49 }
 0x1cb   : > { %3360 = vmatmul.msk.bf16.gmra.mxu2 %vm450_vm2, %v2090_v5  ;;  %v4243_v15 = vadd.f32 %v1653_v54, %v1334_v22  ;;  %v1730_v54 = vrot.slane %v3509_v62, 2  ;;  %v2393_v22 = vrot.slane %v2391_v13, 3  ;;  %v2697_v6 = vsel %vm2684_vm7, %v2694_v2, %v2696_v4 }
 0x1cc   : > { %3398 = vmatmul.msk.bf16.gmra.mxu0 %vm450_vm2, %v2695_v40 }
 0x1cd   : > { %3381 = vmatmul.msk.bf16.gmra.mxu3 %vm450_vm2, %v2386_v7  ;;  %v1731_v5 = vsel %vm1718_vm6, %v1728_v19, %v1730_v54  ;;  %v4575_v19 = vld [vmem:[#allocation2_spill] sm:$0xff] }
 0x1ce   : > { %v926_v56 = vpop.f32.mrf.mxu2 }
 0x1cf   : > { %v974_v20 = vadd.f32 %v926_v56, %v727_v41  ;;  %v728_v27 = vpop.f32.mrf.mxu1  ;;  %v2394_v41 = vor.u32 %v2393_v22, %v2390_v48 }
 0x1d0   : > { %v729_v28 = vadd.f32 %v728_v27, %v4574_v39  ;;  %v2093_v39 = vrot.slane %v4227_v63, 2 }
 0x1d1   : > { %v1335_v24 = vadd.f32 %v1287_v53, %v974_v20  ;;  %v1658_v61 = vpop.f32.mrf.mxu0  ;;  %v1297_v32 = vpop.f32.mrf.mxu3 }
 0x1d3   : > { %v4252_v52 = vadd.f32 %v1656_v42, %v1335_v24  ;;  %v4271_v24 = vld [vmem:[%s3600_s24 + $0x58] sm:$0xff] }
 0x1d6   : > { %v928_v33 = vpop.f32.mrf.mxu2 }
 0x1d7   : > { %v975_v53 = vadd.f32 %v928_v33, %v729_v28  ;;  %v731_v49 = vpop.f32.mrf.mxu1  ;;  %v2397_v28 = vshrl.u32 %v4271_v24, 16  ;;  %v2400_v33 = vshll.u32 %v4271_v24, 16 }
 0x1d8   : > { %v732_v56 = vadd.f32 %v731_v49, %v4575_v19 }
 0x1d9   : > { %v1336_v42 = vadd.f32 %v1289_v58, %v975_v53  ;;  %v1661_v40 = vpop.f32.mrf.mxu0  ;;  %v1299_v20 = vpop.f32.mrf.mxu3  ;;  %v2395_v58 = vsel %vm2315_vm5, %v2385_v57, %v2394_v41  ;;  %v4576_v53 = vld [vmem:[#allocation3_spill] sm:$0xff]  ;;  %v2698_v57 = vrot.slane %v4227_v63, 3 }
 0x1da   : > { %3274 = vmatmul.msk.bf16.gmra.mxu1 %vm450_vm2, %v1731_v5 }
 0x1db   : > { %3361 = vmatmul.msk.bf16.gmra.mxu2 %vm450_vm2, %v2092_v45  ;;  %v4265_v55 = vadd.f32 %v1658_v61, %v1336_v42  ;;  %v3510_v61 = vld [vmem:[%s3600_s24 + $0x40] sm:$0xff]  ;;  %v2094_v42 = vsel %vm1718_vm6, %v2091_v36, %v2093_v39 }
 0x1dc   : > { %3399 = vmatmul.msk.bf16.gmra.mxu0 %vm450_vm2, %v2697_v6  ;;  %v1732_v13 = vrot.slane %v3510_v61, 2  ;;  %v2402_v6 = vrot.slane %v2400_v33, 3 }
 0x1dd   : > { %3382 = vmatmul.msk.bf16.gmra.mxu3 %vm450_vm2, %v2395_v58 }
 0x1de   : > { %v931_v47 = vpop.f32.mrf.mxu2  ;;  %v1733_v22 = vsel %vm1718_vm6, %v1730_v54, %v1732_v13  ;;  %v4577_v54 = vld [vmem:[#allocation4_spill] sm:$0xff] }
 0x1df   : > { %v976_v27 = vadd.f32 %v931_v47, %v732_v56  ;;  %v733_v7 = vpop.f32.mrf.mxu1  ;;  %v2699_v47 = vsel %vm2684_vm7, %v2696_v4, %v2698_v57 }
 0x1e0   : > { %v734_v49 = vadd.f32 %v733_v7, %v4576_v53 }
 0x1e1   : > { %v1337_v2 = vadd.f32 %v1292_v16, %v976_v27  ;;  %v1663_v62 = vpop.f32.mrf.mxu0  ;;  %v1302_v45 = vpop.f32.mrf.mxu3 }
 0x1e3   : > { %v4274_v3 = vadd.f32 %v1661_v40, %v1337_v2  ;;  %v2399_v40 = vrot.slane %v2397_v28, 2  ;;  %v4293_v28 = vld [vmem:[%s3600_s24 + $0x60] sm:$0xff] }
 0x1e5   : > { %v2403_v27 = vor.u32 %v2402_v6, %v2399_v40 }
 0x1e6   : > { %v933_v5 = vpop.f32.mrf.mxu2 }
 0x1e7   : > { %v977_v16 = vadd.f32 %v933_v5, %v734_v49  ;;  %v736_v48 = vpop.f32.mrf.mxu1  ;;  %v2095_v5 = vrot.slane %v4249_v1, 2 }
 0x1e8   : > { %v737_v7 = vadd.f32 %v736_v48, %v4577_v54  ;;  %v2409_v48 = vshll.u32 %v4293_v28, 16 }
 0x1e9   : > { %v1338_v19 = vadd.f32 %v1294_v51, %v977_v16  ;;  %v1666_v56 = vpop.f32.mrf.mxu0  ;;  %v1304_v58 = vpop.f32.mrf.mxu3  ;;  %v2404_v51 = vsel %vm2315_vm5, %v2394_v41, %v2403_v27  ;;  %v2406_v16 = vshrl.u32 %v4293_v28, 16  ;;  %v2700_v41 = vrot.slane %v4249_v1, 3 }
 0x1ea   : > { %3275 = vmatmul.msk.bf16.gmra.mxu1 %vm450_vm2, %v1733_v22  ;;  %v4578_v22 = vld [vmem:[#allocation5_spill] sm:$0xff] }
 0x1eb   : > { %3362 = vmatmul.msk.bf16.gmra.mxu2 %vm450_vm2, %v2094_v42  ;;  %v4287_v63 = vadd.f32 %v1663_v62, %v1338_v19  ;;  %v3511_v62 = vld [vmem:[%s3600_s24 + $0x48] sm:$0xff]  ;;  %v2408_v54 = vrot.slane %v2406_v16, 2 }
 0x1ec   : > { %3400 = vmatmul.msk.bf16.gmra.mxu0 %vm450_vm2, %v2699_v47  ;;  %v1734_v49 = vrot.slane %v3511_v62, 2 }
 0x1ed   : > { %3383 = vmatmul.msk.bf16.gmra.mxu3 %vm450_vm2, %v2404_v51  ;;  %v2701_v51 = vsel %vm2684_vm7, %v2698_v57, %v2700_v41 }
 0x1ee   : > { %v936_v36 = vpop.f32.mrf.mxu2  ;;  %v1735_v47 = vsel %vm1718_vm6, %v1732_v13, %v1734_v49  ;;  %v4579_v13 = vld [vmem:[#allocation6_spill] sm:$0xff] }
 0x1ef   : > { %v978_v2 = vadd.f32 %v936_v36, %v737_v7  ;;  %v738_v61 = vpop.f32.mrf.mxu1  ;;  %v2411_v7 = vrot.slane %v2409_v48, 3 }
 0x1f0   : > { %v739_v42 = vadd.f32 %v738_v61, %v4578_v22  ;;  %v4315_v22 = vld [vmem:[%s3600_s24 + $0x68] sm:$0xff] }
 0x1f1   : > { %v1339_v4 = vadd.f32 %v1297_v32, %v978_v2  ;;  %v1668_v33 = vpop.f32.mrf.mxu0  ;;  %v2552_v6 = vpop.f32.mrf.mxu3  ;;  %v2412_v61 = vor.u32 %v2411_v7, %v2408_v54  ;;  %v4580_v54 = vld [vmem:[#allocation7_spill] sm:$0xff] }
 0x1f3   : > { %v4296_v53 = vadd.f32 %v1666_v56, %v1339_v4  ;;  %v2096_v56 = vsel %vm1718_vm6, %v2093_v39, %v2095_v5 }
 0x1f6   : > { %v938_v40 = vpop.f32.mrf.mxu2 }
 0x1f7   : > { %v979_v32 = vadd.f32 %v938_v40, %v739_v42  ;;  %v741_v19 = vpop.f32.mrf.mxu1 }
 0x1f8   : > { %v742_v4 = vadd.f32 %v741_v19, %v4579_v13  ;;  %v2415_v19 = vshrl.u32 %v4315_v22, 16 }
 0x1f9   : > { %v1340_v36 = vadd.f32 %v1299_v20, %v979_v32  ;;  %v1671_v2 = vpop.f32.mrf.mxu0  ;;  %v2554_v62 = vpop.f32.mrf.mxu3  ;;  %v2413_v20 = vsel %vm2315_vm5, %v2403_v27, %v2412_v61  ;;  %v2702_v27 = vrot.slane %v4271_v24, 3 }
 0x1fa   : > { %3276 = vmatmul.msk.bf16.gmra.mxu1 %vm450_vm2, %v1735_v47  ;;  %v2097_v47 = vrot.slane %v4271_v24, 2 }
 0x1fb   : > { %3363 = vmatmul.msk.bf16.gmra.mxu2 %vm450_vm2, %v2096_v56  ;;  %v4309_v1 = vadd.f32 %v1668_v33, %v1340_v36  ;;  %v3512_v33 = vld [vmem:[%s3600_s24 + $0x50] sm:$0xff]  ;;  %v2418_v56 = vshll.u32 %v4315_v22, 16 }
 0x1fc   : > { %3401 = vmatmul.msk.bf16.gmra.mxu0 %vm450_vm2, %v2701_v51  ;;  %v1736_v32 = vrot.slane %v3512_v33, 2  ;;  %v2703_v33 = vsel %vm2684_vm7, %v2700_v41, %v2702_v27  ;;  %v4338_v41 = vld [vmem:[%s3600_s24 + $0x70] sm:$0xff] }
 0x1fd   : > { %3384 = vmatmul.msk.bf16.gmra.mxu3 %vm450_vm2, %v2413_v20 }
 0x1fe   : > { %v941_v39 = vpop.f32.mrf.mxu2 }
 0x1ff   : > { %v980_v16 = vadd.f32 %v941_v39, %v742_v4  ;;  %v743_v48 = vpop.f32.mrf.mxu1  ;;  %v2098_v4 = vsel %vm1718_vm6, %v2095_v5, %v2097_v47  ;;  %v2417_v39 = vrot.slane %v2415_v19, 2 }
 0x200   : > { %v744_v7 = vadd.f32 %v743_v48, %v4580_v54 }
 0x201   : > { %v1341_v57 = vadd.f32 %v1302_v45, %v980_v16  ;;  %v1673_v42 = vpop.f32.mrf.mxu0  ;;  %v2557_v51 = vpop.f32.mrf.mxu3  ;;  %v2420_v16 = vrot.slane %v2418_v56, 3 }
 0x203   : > { %v4318_v40 = vadd.f32 %v1671_v2, %v1341_v57  ;;  %v1737_v2 = vsel %vm1718_vm6, %v1734_v49, %v1736_v32  ;;  %v2421_v48 = vor.u32 %v2420_v16, %v2417_v39 }
 0x205   : > { %v2422_v54 = vsel %vm2315_vm5, %v2412_v61, %v2421_v48  ;;  %v2427_v61 = vshll.u32 %v4338_v41, 16 }
 0x206   : > { %v943_v36 = vpop.f32.mrf.mxu2 }
 0x207   : > { %v981_v45 = vadd.f32 %v943_v36, %v744_v7  ;;  %v1822_v13 = vpop.f32.mrf.mxu1 }
 0x208   : > { %v1912_v49 = vadd.f32 %v1822_v13, %v3937_v34  ;;  %v3513_v34 = vld [vmem:[%s3600_s24 + $0x58] sm:$0xff]  ;;  %v2099_v13 = vrot.slane %v4293_v28, 2 }
 0x209   : > { %v1342_v20 = vadd.f32 %v1304_v58, %v981_v45  ;;  %v2788_v57 = vpop.f32.mrf.mxu0  ;;  %v2559_v19 = vpop.f32.mrf.mxu3  ;;  %v1738_v45 = vrot.slane %v3513_v34, 2 }
 0x20a   : > { %3277 = vmatmul.msk.bf16.gmra.mxu1 %vm450_vm2, %v1737_v2  ;;  %v2424_v2 = vshrl.u32 %v4338_v41, 16 }
 0x20b   : > { %3364 = vmatmul.msk.bf16.gmra.mxu2 %vm450_vm2, %v2098_v4  ;;  %v4331_v24 = vadd.f32 %v1673_v42, %v1342_v20  ;;  %v2704_v4 = vrot.slane %v4293_v28, 3 }
 0x20c   : > { %3402 = vmatmul.msk.bf16.gmra.mxu0 %vm450_vm2, %v2703_v33  ;;  %v1739_v33 = vsel %vm1718_vm6, %v1736_v32, %v1738_v45 }
 0x20d   : > { %3385 = vmatmul.msk.bf16.gmra.mxu3 %vm450_vm2, %v2422_v54 }
 0x20e   : > { %v2183_v5 = vpop.f32.mrf.mxu2 }
 0x20f   : > { %v2273_v56 = vadd.f32 %v2183_v5, %v1912_v49  ;;  %v1824_v58 = vpop.f32.mrf.mxu1  ;;  %v2100_v49 = vsel %vm1718_vm6, %v2097_v47, %v2099_v13  ;;  %v2426_v5 = vrot.slane %v2424_v2, 2 }
 0x211   : > { %v2642_v7 = vadd.f32 %v2552_v6, %v2273_v56  ;;  %v2790_v36 = vpop.f32.mrf.mxu0  ;;  %v1913_v6 = vadd.f32 %v1824_v58, %v3947_v26  ;;  %v2562_v16 = vpop.f32.mrf.mxu3  ;;  %v2429_v56 = vrot.slane %v2427_v61, 3 }
 0x213   : > { %v2878_v42 = vadd.f32 %v2788_v57, %v2642_v7  ;;  %v2430_v26 = vor.u32 %v2429_v56, %v2426_v5 }
 0x215   : > { %2914 = vst [vmem:[%s4343_s14] sm:$0xff] %v2878_v42  ;;  %v2705_v42 = vsel %vm2684_vm7, %v2702_v27, %v2704_v4  ;;  %v2431_v2 = vsel %vm2315_vm5, %v2421_v48, %v2430_v26  ;;  %v4363_v27 = vld [vmem:[%s3600_s24 + $0x78] sm:$0xff]  ;;  %v2706_v48 = vrot.slane %v4315_v22, 3 }
 0x216   : > { %v2185_v39 = vpop.f32.mrf.mxu2 }
 0x217   : > { %v2274_v20 = vadd.f32 %v2185_v39, %v1913_v6  ;;  %v1827_v57 = vpop.f32.mrf.mxu1  ;;  %v3514_v39 = vld [vmem:[%s3600_s24 + $0x60] sm:$0xff] }
 0x218   : > { %v1914_v28 = vadd.f32 %v1827_v57, %v3953_v18  ;;  %v2433_v18 = vshrl.u32 %v4363_v27, 16  ;;  %v2436_v57 = vshll.u32 %v4363_v27, 16 }
 0x219   : > { %v2643_v54 = vadd.f32 %v2554_v62, %v2274_v20  ;;  %v2793_v7 = vpop.f32.mrf.mxu0  ;;  %v2564_v47 = vpop.f32.mrf.mxu3  ;;  %v1740_v20 = vrot.slane %v3514_v39, 2 }
 0x21a   : > { %3278 = vmatmul.msk.bf16.gmra.mxu1 %vm450_vm2, %v1739_v33  ;;  %v2101_v33 = vrot.slane %v4315_v22, 2 }
 0x21b   : > { %v2879_v34 = vadd.f32 %v2790_v36, %v2643_v54  ;;  %3365 = vmatmul.msk.bf16.gmra.mxu2 %vm450_vm2, %v2100_v49 }
 0x21c   : > { %3403 = vmatmul.msk.bf16.gmra.mxu0 %vm450_vm2, %v2705_v42  ;;  %v2102_v42 = vsel %vm1718_vm6, %v2099_v13, %v2101_v33 }
 0x21d   : > { %2915 = vst [vmem:[%s4343_s14 + $0x8] sm:$0xff] %v2879_v34  ;;  %3386 = vmatmul.msk.bf16.gmra.mxu3 %vm450_vm2, %v2431_v2  ;;  %v2435_v34 = vrot.slane %v2433_v18, 2  ;;  %v2707_v2 = vsel %vm2684_vm7, %v2704_v4, %v2706_v48  ;;  %v4383_v4 = vld [vmem:[%s3600_s24 + $0x80] sm:$0xff] }
 0x21e   : > { %v2188_v32 = vpop.f32.mrf.mxu2 }
 0x21f   : > { %v2275_v58 = vadd.f32 %v2188_v32, %v1914_v28  ;;  %v1829_v62 = vpop.f32.mrf.mxu1  ;;  %v2438_v28 = vrot.slane %v2436_v57, 3  ;;  %v3515_v57 = vld [vmem:[%s3600_s24 + $0x68] sm:$0xff] }
 0x220   : > { %v1915_v49 = vadd.f32 %v1829_v62, %v3963_v30 }
 0x221   : > { %v2644_v36 = vadd.f32 %v2557_v51, %v2275_v58  ;;  %v2795_v61 = vpop.f32.mrf.mxu0  ;;  %v2567_v51 = vpop.f32.mrf.mxu3  ;;  %v2439_v30 = vor.u32 %v2438_v28, %v2435_v34 }
 0x223   : > { %v2880_v6 = vadd.f32 %v2793_v7, %v2644_v36  ;;  %v1741_v7 = vsel %vm1718_vm6, %v1738_v45, %v1740_v20 }
 0x225   : > { %2916 = vst [vmem:[%s4343_s14 + $0x10] sm:$0xff] %v2880_v6  ;;  %v2440_v6 = vsel %vm2315_vm5, %v2430_v26, %v2439_v30  ;;  %v2708_v26 = vrot.slane %v4338_v41, 3 }
 0x226   : > { %v2190_v5 = vpop.f32.mrf.mxu2 }
 0x227   : > { %v2276_v56 = vadd.f32 %v2190_v5, %v1915_v49  ;;  %v1832_v54 = vpop.f32.mrf.mxu1  ;;  %v1742_v49 = vrot.slane %v3515_v57, 2  ;;  %v2103_v5 = vrot.slane %v4338_v41, 2  ;;  %v3516_v57 = vld [vmem:[%s3600_s24 + $0x70] sm:$0xff] }
 0x228   : > { %v1916_v22 = vadd.f32 %v1832_v54, %v3969_v60  ;;  %v2442_v60 = vshrl.u32 %v4383_v4, 16 }
 0x229   : > { %v2645_v32 = vadd.f32 %v2559_v19, %v2276_v56  ;;  %v2798_v58 = vpop.f32.mrf.mxu0  ;;  %v2569_v13 = vpop.f32.mrf.mxu3  ;;  %v2445_v56 = vshll.u32 %v4383_v4, 16  ;;  %v1743_v28 = vsel %vm1718_vm6, %v1740_v20, %v1742_v49 }
 0x22a   : > { %3279 = vmatmul.msk.bf16.gmra.mxu1 %vm450_vm2, %v1741_v7 }
 0x22b   : > { %v2881_v36 = vadd.f32 %v2795_v61, %v2645_v32  ;;  %3366 = vmatmul.msk.bf16.gmra.mxu2 %vm450_vm2, %v2102_v42  ;;  %v2104_v32 = vsel %vm1718_vm6, %v2101_v33, %v2103_v5 }
 0x22c   : > { %3404 = vmatmul.msk.bf16.gmra.mxu0 %vm450_vm2, %v2707_v2  ;;  %v2447_v2 = vrot.slane %v2445_v56, 3  ;;  %v2105_v56 = vrot.slane %v4363_v27, 2 }
 0x22d   : > { %2917 = vst [vmem:[%s4343_s14 + $0x18] sm:$0xff] %v2881_v36  ;;  %3387 = vmatmul.msk.bf16.gmra.mxu3 %vm450_vm2, %v2440_v6 }
 0x22e   : > { %v2193_v45 = vpop.f32.mrf.mxu2 }
 0x22f   : > { %v2277_v62 = vadd.f32 %v2193_v45, %v1916_v22  ;;  %v1834_v19 = vpop.f32.mrf.mxu1  ;;  %v2709_v45 = vsel %vm2684_vm7, %v2706_v48, %v2708_v26  ;;  %v4403_v48 = vld [vmem:[%s3600_s24 + $0x88] sm:$0xff] }
 0x230   : > { %v1917_v54 = vadd.f32 %v1834_v19, %v3979_v37 }
 0x231   : > { %v2646_v61 = vadd.f32 %v2562_v16, %v2277_v62  ;;  %v2800_v39 = vpop.f32.mrf.mxu0  ;;  %v2572_v16 = vpop.f32.mrf.mxu3 }
 0x233   : > { %v2882_v18 = vadd.f32 %v2798_v58, %v2646_v61  ;;  %v2444_v58 = vrot.slane %v2442_v60, 2  ;;  %v1744_v60 = vrot.slane %v3516_v57, 2  ;;  %v2107_v57 = vrot.slane %v4383_v4, 2 }
 0x235   : > { %2918 = vst [vmem:[%s4343_s14 + $0x20] sm:$0xff] %v2882_v18  ;;  %v2448_v37 = vor.u32 %v2447_v2, %v2444_v58  ;;  %v2106_v58 = vsel %vm1718_vm6, %v2103_v5, %v2105_v56 }
 0x236   : > { %v2195_v7 = vpop.f32.mrf.mxu2 }
 0x237   : > { %v2278_v42 = vadd.f32 %v2195_v7, %v1917_v54  ;;  %v1837_v34 = vpop.f32.mrf.mxu1  ;;  %v2449_v6 = vsel %vm2315_vm5, %v2439_v30, %v2448_v37  ;;  %v2454_v54 = vshll.u32 %v4403_v48, 16  ;;  %v2710_v30 = vrot.slane %v4363_v27, 3 }
 0x238   : > { %v1918_v41 = vadd.f32 %v1837_v34, %v3985_v10  ;;  %v2451_v10 = vshrl.u32 %v4403_v48, 16 }
 0x239   : > { %v2647_v36 = vadd.f32 %v2564_v47, %v2278_v42  ;;  %v2803_v22 = vpop.f32.mrf.mxu0  ;;  %v2574_v33 = vpop.f32.mrf.mxu3 }
 0x23a   : > { %3280 = vmatmul.msk.bf16.gmra.mxu1 %vm450_vm2, %v1743_v28  ;;  %v2453_v2 = vrot.slane %v2451_v10, 2 }
 0x23b   : > { %v2883_v62 = vadd.f32 %v2800_v39, %v2647_v36  ;;  %3367 = vmatmul.msk.bf16.gmra.mxu2 %vm450_vm2, %v2104_v32  ;;  %v1745_v32 = vsel %vm1718_vm6, %v1742_v49, %v1744_v60  ;;  %v2456_v36 = vrot.slane %v2454_v54, 3 }
 0x23c   : > { %3405 = vmatmul.msk.bf16.gmra.mxu0 %vm450_vm2, %v2709_v45 }
 0x23d   : > { %2919 = vst [vmem:[%s4343_s14 + $0x28] sm:$0xff] %v2883_v62  ;;  %3388 = vmatmul.msk.bf16.gmra.mxu3 %vm450_vm2, %v2449_v6  ;;  %v2711_v62 = vsel %vm2684_vm7, %v2708_v26, %v2710_v30  ;;  %v4423_v26 = vld [vmem:[%s3600_s24 + $0x90] sm:$0xff] }
 0x23e   : > { %v2198_v20 = vpop.f32.mrf.mxu2  ;;  %v2463_v10 = vshll.u32 %v4423_v26, 16 }
 0x23f   : > { %v2279_v19 = vadd.f32 %v2198_v20, %v1918_v41  ;;  %v1839_v47 = vpop.f32.mrf.mxu1 }
 0x240   : > { %v1919_v7 = vadd.f32 %v1839_v47, %v3995_v0  ;;  %v2457_v0 = vor.u32 %v2456_v36, %v2453_v2  ;;  %v2465_v2 = vrot.slane %v2463_v10, 3 }
 0x241   : > { %v2648_v61 = vadd.f32 %v2567_v51, %v2279_v19  ;;  %v2805_v39 = vpop.f32.mrf.mxu0  ;;  %v2577_v51 = vpop.f32.mrf.mxu3 }
 0x242   : > { %v2458_v19 = vsel %vm2315_vm5, %v2448_v37, %v2457_v0  ;;  %v2712_v37 = vrot.slane %v4383_v4, 3 }
 0x243   : > { %v2884_v18 = vadd.f32 %v2803_v22, %v2648_v61 }
 0x245   : > { %2920 = vst [vmem:[%s4343_s14 + $0x30] sm:$0xff] %v2884_v18 }
 0x246   : > { %v2200_v42 = vpop.f32.mrf.mxu2 }
 0x247   : > { %v2280_v34 = vadd.f32 %v2200_v42, %v1919_v7  ;;  %v1842_v28 = vpop.f32.mrf.mxu1 }
 0x248   : > { %v1920_v27 = vadd.f32 %v1842_v28, %v4001_v11  ;;  %v2460_v11 = vshrl.u32 %v4423_v26, 16 }
 0x249   : > { %v2649_v22 = vadd.f32 %v2569_v13, %v2280_v34  ;;  %v2808_v45 = vpop.f32.mrf.mxu0  ;;  %v2579_v5 = vpop.f32.mrf.mxu3 }
 0x24a   : > { %3281 = vmatmul.msk.bf16.gmra.mxu1 %vm450_vm2, %v1745_v32  ;;  %v2108_v32 = vsel %vm1718_vm6, %v2105_v56, %v2107_v57 }
 0x24b   : > { %v2885_v41 = vadd.f32 %v2805_v39, %v2649_v22  ;;  %3368 = vmatmul.msk.bf16.gmra.mxu2 %vm450_vm2, %v2106_v58  ;;  %v3517_v39 = vld [vmem:[%s3600_s24 + $0x78] sm:$0xff]  ;;  %v2462_v58 = vrot.slane %v2460_v11, 2 }
 0x24c   : > { %3406 = vmatmul.msk.bf16.gmra.mxu0 %vm450_vm2, %v2711_v62  ;;  %v1746_v18 = vrot.slane %v3517_v39, 2 }
 0x24d   : > { %2921 = vst [vmem:[%s4343_s14 + $0x38] sm:$0xff] %v2885_v41  ;;  %3389 = vmatmul.msk.bf16.gmra.mxu3 %vm450_vm2, %v2458_v19  ;;  %v3518_v19 = vld [vmem:[%s3600_s24 + $0x80] sm:$0xff] }
 0x24e   : > { %v2203_v49 = vpop.f32.mrf.mxu2  ;;  %v1747_v28 = vsel %vm1718_vm6, %v1744_v60, %v1746_v18 }
 0x24f   : > { %v2281_v20 = vadd.f32 %v2203_v49, %v1920_v27  ;;  %v1844_v13 = vpop.f32.mrf.mxu1  ;;  %v4445_v27 = vld [vmem:[%s3600_s24 + $0x98] sm:$0xff] }
 0x250   : > { %v1921_v54 = vadd.f32 %v1844_v13, %v4011_v17  ;;  %v2466_v17 = vor.u32 %v2465_v2, %v2462_v58 }
 0x251   : > { %v2650_v47 = vadd.f32 %v2572_v16, %v2281_v20  ;;  %v2810_v6 = vpop.f32.mrf.mxu0  ;;  %v2582_v16 = vpop.f32.mrf.mxu3 }
 0x253   : > { %v2886_v61 = vadd.f32 %v2808_v45, %v2650_v47  ;;  %v2713_v45 = vsel %vm2684_vm7, %v2710_v30, %v2712_v37  ;;  %v2467_v30 = vsel %vm2315_vm5, %v2457_v0, %v2466_v17  ;;  %v1748_v47 = vrot.slane %v3518_v19, 2  ;;  %v4581_v19 = vld [vmem:[#allocation10_spill] sm:$0xff] }
 0x254   : > { %v2714_v0 = vrot.slane %v4403_v48, 3 }
 0x255   : > { %2922 = vst [vmem:[%s4343_s14 + $0x40] sm:$0xff] %v2886_v61  ;;  %v2472_v61 = vshll.u32 %v4445_v27, 16 }
 0x256   : > { %v2205_v7 = vpop.f32.mrf.mxu2  ;;  %v2715_v2 = vsel %vm2684_vm7, %v2712_v37, %v2714_v0 }
 0x257   : > { %v2282_v42 = vadd.f32 %v2205_v7, %v1921_v54  ;;  %v1847_v34 = vpop.f32.mrf.mxu1  ;;  %v1749_v7 = vsel %vm1718_vm6, %v1746_v18, %v1748_v47 }
 0x258   : > { %v1922_v4 = vadd.f32 %v1847_v34, %v4017_v38  ;;  %v2469_v38 = vshrl.u32 %v4445_v27, 16 }
 0x259   : > { %v2651_v36 = vadd.f32 %v2574_v33, %v2282_v42  ;;  %v2813_v22 = vpop.f32.mrf.mxu0  ;;  %v4441_v56 = vpop.f32.mrf.mxu3 }
 0x25a   : > { %3282 = vmatmul.msk.bf16.gmra.mxu1 %vm450_vm2, %v1747_v28  ;;  %v2471_v34 = vrot.slane %v2469_v38, 2  ;;  %v2474_v28 = vrot.slane %v2472_v61, 3 }
 0x25b   : > { %v2887_v62 = vadd.f32 %v2810_v6, %v2651_v36  ;;  %3369 = vmatmul.msk.bf16.gmra.mxu2 %vm450_vm2, %v2108_v32  ;;  %v2109_v6 = vrot.slane %v4403_v48, 2  ;;  %v2309_v36 = vld [vmem:[%s3600_s24 + $0xa0] sm:$0x7] }
 0x25c   : > { %3407 = vmatmul.msk.bf16.gmra.mxu0 %vm450_vm2, %v2713_v45  ;;  %v2313_v48 = vunpack.c.l.b16 %v2309_v36 }
 0x25d   : > { %2923 = vst [vmem:[%s4343_s14 + $0x48] sm:$0xff] %v2887_v62  ;;  %3390 = vmatmul.msk.bf16.gmra.mxu3 %vm450_vm2, %v2467_v30  ;;  %v2110_v42 = vsel %vm1718_vm6, %v2107_v57, %v2109_v6  ;;  %v3519_v30 = vld [vmem:[%s3600_s24 + $0x88] sm:$0xff] }
 0x25e   : > { %v2208_v60 = vpop.f32.mrf.mxu2 }
 0x25f   : > { %v2283_v33 = vadd.f32 %v2208_v60, %v1922_v4  ;;  %v1849_v41 = vpop.f32.mrf.mxu1  ;;  %v4465_v4 = vpack.c.b16 %v2313_v48, %v2313_v48 }
 0x260   : > { %v1923_v39 = vadd.f32 %v1849_v41, %v4027_v31  ;;  %v2475_v31 = vor.u32 %v2474_v28, %v2471_v34 }
 0x261   : > { %v2652_v49 = vadd.f32 %v2577_v51, %v2283_v33  ;;  %v2815_v20 = vpop.f32.mrf.mxu0  ;;  %v2587_v51 = vpop.f32.mrf.mxu3 }
 0x262   : > { %v2476_v37 = vsel %vm2315_vm5, %v2466_v17, %v2475_v31  ;;  %v2716_v17 = vrot.slane %v4423_v26, 3 }
 0x263   : > { %v2888_v13 = vadd.f32 %v2813_v22, %v2652_v49  ;;  %v1750_v49 = vrot.slane %v3519_v30, 2 }
 0x265   : > { %2924 = vst [vmem:[%s4343_s14 + $0x50] sm:$0xff] %v2888_v13  ;;  %v2481_v13 = vshll.u32 %v4465_v4, 16 }
 0x266   : > { %v2210_v11 = vpop.f32.mrf.mxu2 }
 0x267   : > { %v2284_v10 = vadd.f32 %v2210_v11, %v1923_v39  ;;  %v1852_v54 = vpop.f32.mrf.mxu1 }
 0x268   : > { %v1924_v18 = vadd.f32 %v1852_v54, %v4036_v35  ;;  %v2478_v35 = vshrl.u32 %v4465_v4, 16 }
 0x269   : > { %v2653_v32 = vadd.f32 %v2579_v5, %v2284_v10  ;;  %v2818_v58 = vpop.f32.mrf.mxu0  ;;  %v2589_v5 = vpop.f32.mrf.mxu3  ;;  %v1751_v10 = vsel %vm1718_vm6, %v1748_v47, %v1750_v49  ;;  %v4582_v47 = vld [vmem:[#allocation11_spill] sm:$0xff] }
 0x26a   : > { %3283 = vmatmul.msk.bf16.gmra.mxu1 %vm450_vm2, %v1749_v7  ;;  %v2480_v7 = vrot.slane %v2478_v35, 2 }
 0x26b   : > { %v2889_v22 = vadd.f32 %v2815_v20, %v2653_v32  ;;  %3370 = vmatmul.msk.bf16.gmra.mxu2 %vm450_vm2, %v2110_v42  ;;  %v2111_v20 = vrot.slane %v4423_v26, 2  ;;  %v2483_v42 = vrot.slane %v2481_v13, 3  ;;  %v2717_v32 = vsel %vm2684_vm7, %v2714_v0, %v2716_v17 }
 0x26c   : > { %3408 = vmatmul.msk.bf16.gmra.mxu0 %vm450_vm2, %v2715_v2 }
 0x26d   : > { %2925 = vst [vmem:[%s4343_s14 + $0x58] sm:$0xff] %v2889_v22  ;;  %3391 = vmatmul.msk.bf16.gmra.mxu3 %vm450_vm2, %v2476_v37  ;;  %v2112_v54 = vsel %vm1718_vm6, %v2109_v6, %v2111_v20  ;;  %v2484_v26 = vor.u32 %v2483_v42, %v2480_v7  ;;  %v2113_v37 = vrot.slane %v4445_v27, 2 }
 0x26e   : > { %v2213_v57 = vpop.f32.mrf.mxu2 }
 0x26f   : > { %v2285_v45 = vadd.f32 %v2213_v57, %v1924_v18  ;;  %v1854_v62 = vpop.f32.mrf.mxu1  ;;  %v2485_v48 = vsel %vm2315_vm5, %v2475_v31, %v2484_v26  ;;  %v2114_v13 = vsel %vm1718_vm6, %v2111_v20, %v2113_v37 }
 0x270   : > { %v1925_v38 = vadd.f32 %v1854_v62, %v4581_v19 }
 0x271   : > { %v2654_v60 = vadd.f32 %v2582_v16, %v2285_v45  ;;  %v2820_v33 = vpop.f32.mrf.mxu0  ;;  %v2592_v16 = vpop.f32.mrf.mxu3  ;;  %v3520_v45 = vld [vmem:[%s3600_s24 + $0x90] sm:$0xff] }
 0x272   : > { %v1752_v62 = vrot.slane %v3520_v45, 2 }
 0x273   : > { %v2890_v41 = vadd.f32 %v2818_v58, %v2654_v60 }
 0x275   : > { %2926 = vst [vmem:[%s4343_s14 + $0x60] sm:$0xff] %v2890_v41 }
 0x276   : > { %v2215_v61 = vpop.f32.mrf.mxu2 }
 0x277   : > { %v2286_v39 = vadd.f32 %v2215_v61, %v1925_v38  ;;  %v1857_v11 = vpop.f32.mrf.mxu1 }
 0x278   : > { %v1926_v6 = vadd.f32 %v1857_v11, %v4582_v47 }
 0x279   : > { %v2655_v34 = vadd.f32 %v4441_v56, %v2286_v39  ;;  %v2823_v28 = vpop.f32.mrf.mxu0  ;;  %v2594_v36 = vpop.f32.mrf.mxu3  ;;  %v1984_v39 = vld [vmem:[%s3600_s24 + $0xa0] sm:$0x3] }
 0x27a   : > { %3284 = vmatmul.msk.bf16.gmra.mxu1 %vm450_vm2, %v1751_v10 }
 0x27b   : > { %v2891_v58 = vadd.f32 %v2820_v33, %v2655_v34  ;;  %3371 = vmatmul.msk.bf16.gmra.mxu2 %vm450_vm2, %v2112_v54  ;;  %v2718_v33 = vrot.slane %v4445_v27, 3  ;;  %v1754_v34 = vrot.slane %v4087_v12, 2 }
 0x27c   : > { %3409 = vmatmul.msk.bf16.gmra.mxu0 %vm450_vm2, %v2717_v32 }
 0x27d   : > { %2927 = vst [vmem:[%s4343_s14 + $0x68] sm:$0xff] %v2891_v58  ;;  %3392 = vmatmul.msk.bf16.gmra.mxu3 %vm450_vm2, %v2485_v48  ;;  %v2719_v61 = vsel %vm2684_vm7, %v2716_v17, %v2718_v33  ;;  %v2720_v58 = vrot.slane %v4465_v4, 3 }
 0x27e   : > { %v2218_v2 = vpop.f32.mrf.mxu2 }
 0x27f   : > { %v2287_v22 = vadd.f32 %v2218_v2, %v1926_v6  ;;  %v1859_v56 = vpop.f32.mrf.mxu1  ;;  %v1755_v2 = vsel %vm1718_vm6, %v1752_v62, %v1754_v34  ;;  %v2721_v12 = vsel %vm2684_vm7, %v2718_v33, %v2720_v58 }
 0x280   : > { %v1927_v60 = vadd.f32 %v1859_v56, %v4092_v44  ;;  %v2060_v44 = vunpack.c.l.b16 %v1984_v39 }
 0x281   : > { %v2656_v0 = vadd.f32 %v2587_v51, %v2287_v22  ;;  %v2825_v18 = vpop.f32.mrf.mxu0  ;;  %v2597_v30 = vpop.f32.mrf.mxu3  ;;  %v1753_v51 = vsel %vm1718_vm6, %v1750_v49, %v1752_v62 }
 0x282   : > { %v2079_v54 = vpack.c.b16 %v2060_v44, %v2060_v44 }
 0x283   : > { %v2892_v57 = vadd.f32 %v2823_v28, %v2656_v0 }
 0x284   : > { %v2115_v28 = vrot.slane %v2079_v54, 2 }
 0x285   : > { %2928 = vst [vmem:[%s4343_s14 + $0x70] sm:$0xff] %v2892_v57 }
 0x286   : > { %v2220_v41 = vpop.f32.mrf.mxu2  ;;  %v2116_v22 = vsel %vm1718_vm6, %v2113_v37, %v2115_v28 }
 0x287   : > { %v2288_v35 = vadd.f32 %v2220_v41, %v1927_v60  ;;  %v1862_v31 = vpop.f32.mrf.mxu1 }
 0x288   : > { %v1928_v27 = vadd.f32 %v1862_v31, %v4106_v9 }
 0x289   : > { %v2657_v19 = vadd.f32 %v2589_v5, %v2288_v35  ;;  %v2828_v38 = vpop.f32.mrf.mxu0  ;;  %v2599_v10 = vpop.f32.mrf.mxu3 }
 0x28a   : > { %3285 = vmatmul.msk.bf16.gmra.mxu1 %vm450_vm2, %v1753_v51 }
 0x28b   : > { %v2893_v11 = vadd.f32 %v2825_v18, %v2657_v19  ;;  %3372 = vmatmul.msk.bf16.gmra.mxu2 %vm450_vm2, %v2114_v13 }
 0x28c   : > { %3410 = vmatmul.msk.bf16.gmra.mxu0 %vm450_vm2, %v2719_v61 }
 0x28d   : > { %2929 = vst [vmem:[%s4343_s14 + $0x78] sm:$0xff] %v2893_v11 }
 0x28e   : > { %v2223_v49 = vpop.f32.mrf.mxu2 }
 0x28f   : > { %v2289_v20 = vadd.f32 %v2223_v49, %v1928_v27  ;;  %v1864_v5 = vpop.f32.mrf.mxu1 }
 0x290   : > { %v1929_v32 = vadd.f32 %v1864_v5, %v4122_v46 }
 0x291   : > { %v2658_v7 = vadd.f32 %v2592_v16, %v2289_v20  ;;  %v2830_v17 = vpop.f32.mrf.mxu0  ;;  %v2602_v47 = vpop.f32.mrf.mxu3 }
 0x293   : > { %v2894_v42 = vadd.f32 %v2828_v38, %v2658_v7 }
 0x295   : > { %2930 = vst [vmem:[%s4343_s14 + $0x80] sm:$0xff] %v2894_v42 }
 0x296   : > { %v2225_v26 = vpop.f32.mrf.mxu2 }
 0x297   : > { %v2290_v9 = vadd.f32 %v2225_v26, %v1929_v32  ;;  %v1867_v6 = vpop.f32.mrf.mxu1 }
 0x298   : > { %v1930_v46 = vadd.f32 %v1867_v6, %v4139_v14 }
 0x299   : > { %v2659_v16 = vadd.f32 %v2594_v36, %v2290_v9  ;;  %v2833_v56 = vpop.f32.mrf.mxu0  ;;  %v2604_v0 = vpop.f32.mrf.mxu3 }
 0x29a   : > { %3286 = vmatmul.msk.bf16.gmra.mxu1 %vm450_vm2, %v1755_v2 }
 0x29b   : > { %v2895_v48 = vadd.f32 %v2830_v17, %v2659_v16  ;;  %3373 = vmatmul.msk.bf16.gmra.mxu2 %vm450_vm2, %v2116_v22 }
 0x29c   : > { %3411 = vmatmul.msk.bf16.gmra.mxu0 %vm450_vm2, %v2721_v12 }
 0x29d   : > { %2931 = vst [vmem:[%s4343_s14 + $0x88] sm:$0xff] %v2895_v48 }
 0x29e   : > { %v2228_v4 = vpop.f32.mrf.mxu2 }
 0x29f   : > { %v2291_v18 = vadd.f32 %v2228_v4, %v1930_v46  ;;  %v1869_v57 = vpop.f32.mrf.mxu1 }
 0x2a0   : > { %v1931_v37 = vadd.f32 %v1869_v57, %v4153_v21 }
 0x2a1   : > { %v2660_v36 = vadd.f32 %v2597_v30, %v2291_v18  ;;  %v2835_v45 = vpop.f32.mrf.mxu0  ;;  %v2607_v33 = vpop.f32.mrf.mxu3 }
 0x2a3   : > { %v2896_v62 = vadd.f32 %v2833_v56, %v2660_v36 }
 0x2a5   : > { %2932 = vst [vmem:[%s4343_s14 + $0x90] sm:$0xff] %v2896_v62 }
 0x2a6   : > { %v2230_v60 = vpop.f32.mrf.mxu2 }
 0x2a7   : > { %v2292_v41 = vadd.f32 %v2230_v60, %v1931_v37  ;;  %v1872_v35 = vpop.f32.mrf.mxu1 }
 0x2a8   : > { %v1932_v14 = vadd.f32 %v1872_v35, %v4163_v23 }
 0x2a9   : > { %v2661_v31 = vadd.f32 %v2599_v10, %v2292_v41  ;;  %v2838_v51 = vpop.f32.mrf.mxu0  ;;  %v2609_v61 = vpop.f32.mrf.mxu3 }
 0x2ab   : > { %v2897_v13 = vadd.f32 %v2835_v45, %v2661_v31 }
 0x2ad   : > { %2933 = vst [vmem:[%s4343_s14 + $0x98] sm:$0xff] %v2897_v13 }
 0x2ae   : > { %v2233_v19 = vpop.f32.mrf.mxu2 }
 0x2af   : > { %v2293_v38 = vadd.f32 %v2233_v19, %v1932_v14  ;;  %v1874_v30 = vpop.f32.mrf.mxu1 }
 0x2b0   : > { %v1933_v21 = vadd.f32 %v1874_v30, %v4177_v59 }
 0x2b1   : > { %v2662_v39 = vadd.f32 %v2602_v47, %v2293_v38  ;;  %v2840_v11 = vpop.f32.mrf.mxu0  ;;  %v2612_v54 = vpop.f32.mrf.mxu3 }
 0x2b3   : > { %v2898_v44 = vadd.f32 %v2838_v51, %v2662_v39 }
 0x2b5   : > { %2934 = vst [vmem:[%s4343_s14 + $0xa0] sm:$0xff] %v2898_v44 }
 0x2b6   : > { %v2235_v27 = vpop.f32.mrf.mxu2 }
 0x2b7   : > { %v2294_v49 = vadd.f32 %v2235_v27, %v1933_v21  ;;  %v1877_v10 = vpop.f32.mrf.mxu1 }
 0x2b8   : > { %v1934_v23 = vadd.f32 %v1877_v10, %v4186_v43 }
 0x2b9   : > { %v2663_v20 = vadd.f32 %v2604_v0, %v2294_v49  ;;  %v2843_v5 = vpop.f32.mrf.mxu0  ;;  %v2614_v26 = vpop.f32.mrf.mxu3 }
 0x2bb   : > { %v2899_v7 = vadd.f32 %v2840_v11, %v2663_v20 }
 0x2bd   : > { %2935 = vst [vmem:[%s4343_s14 + $0xa8] sm:$0xff] %v2899_v7 }
 0x2be   : > { %v2238_v17 = vpop.f32.mrf.mxu2 }
 0x2bf   : > { %v2295_v42 = vadd.f32 %v2238_v17, %v1934_v23  ;;  %v1879_v34 = vpop.f32.mrf.mxu1 }
 0x2c0   : > { %v1935_v59 = vadd.f32 %v1879_v34, %v4199_v25 }
 0x2c1   : > { %v2664_v28 = vadd.f32 %v2607_v33, %v2295_v42  ;;  %v2845_v32 = vpop.f32.mrf.mxu0  ;;  %v2617_v12 = vpop.f32.mrf.mxu3 }
 0x2c3   : > { %v2900_v58 = vadd.f32 %v2843_v5, %v2664_v28 }
 0x2c5   : > { %2936 = vst [vmem:[%s4343_s14 + $0xb0] sm:$0xff] %v2900_v58 }
 0x2c6   : > { %v2240_v47 = vpop.f32.mrf.mxu2 }
 0x2c7   : > { %v2296_v9 = vadd.f32 %v2240_v47, %v1935_v59  ;;  %v1882_v6 = vpop.f32.mrf.mxu1 }
 0x2c8   : > { %v1936_v43 = vadd.f32 %v1882_v6, %v4208_v8 }
 0x2c9   : > { %v2665_v2 = vadd.f32 %v2609_v61, %v2296_v9  ;;  %v2848_v22 = vpop.f32.mrf.mxu0  ;;  %v2619_v62 = vpop.f32.mrf.mxu3 }
 0x2cb   : > { %v2901_v16 = vadd.f32 %v2845_v32, %v2665_v2 }
 0x2cd   : > { %2937 = vst [vmem:[%s4343_s14 + $0xb8] sm:$0xff] %v2901_v16 }
 0x2ce   : > { %v2243_v56 = vpop.f32.mrf.mxu2 }
 0x2cf   : > { %v2297_v48 = vadd.f32 %v2243_v56, %v1936_v43  ;;  %v1884_v46 = vpop.f32.mrf.mxu1 }
 0x2d0   : > { %v1937_v25 = vadd.f32 %v1884_v46, %v4221_v50 }
 0x2d1   : > { %v2666_v4 = vadd.f32 %v2612_v54, %v2297_v48  ;;  %v2850_v0 = vpop.f32.mrf.mxu0  ;;  %v2622_v14 = vpop.f32.mrf.mxu3 }
 0x2d3   : > { %v2902_v18 = vadd.f32 %v2848_v22, %v2666_v4 }
 0x2d5   : > { %2938 = vst [vmem:[%s4343_s14 + $0xc0] sm:$0xff] %v2902_v18 }
 0x2d6   : > { %v2245_v57 = vpop.f32.mrf.mxu2 }
 0x2d7   : > { %v2298_v36 = vadd.f32 %v2245_v57, %v1937_v25  ;;  %v1887_v45 = vpop.f32.mrf.mxu1 }
 0x2d8   : > { %v1938_v8 = vadd.f32 %v1887_v45, %v4230_v29 }
 0x2d9   : > { %v2667_v37 = vadd.f32 %v2614_v26, %v2298_v36  ;;  %v2853_v60 = vpop.f32.mrf.mxu0  ;;  %v2624_v21 = vpop.f32.mrf.mxu3 }
 0x2db   : > { %v2903_v33 = vadd.f32 %v2850_v0, %v2667_v37 }
 0x2dd   : > { %2939 = vst [vmem:[%s4343_s14 + $0xc8] sm:$0xff] %v2903_v33 }
 0x2de   : > { %v2248_v41 = vpop.f32.mrf.mxu2 }
 0x2df   : > { %v2299_v35 = vadd.f32 %v2248_v41, %v1938_v8  ;;  %v1889_v31 = vpop.f32.mrf.mxu1 }
 0x2e0   : > { %v1939_v50 = vadd.f32 %v1889_v31, %v4243_v15 }
 0x2e1   : > { %v2668_v51 = vadd.f32 %v2617_v12, %v2299_v35  ;;  %v2855_v13 = vpop.f32.mrf.mxu0  ;;  %v2627_v23 = vpop.f32.mrf.mxu3 }
 0x2e3   : > { %v2904_v19 = vadd.f32 %v2853_v60, %v2668_v51 }
 0x2e5   : > { %2940 = vst [vmem:[%s4343_s14 + $0xd0] sm:$0xff] %v2904_v19 }
 0x2e6   : > { %v2250_v38 = vpop.f32.mrf.mxu2 }
 0x2e7   : > { %v2300_v30 = vadd.f32 %v2250_v38, %v1939_v50  ;;  %v1892_v61 = vpop.f32.mrf.mxu1 }
 0x2e8   : > { %v1940_v29 = vadd.f32 %v1892_v61, %v4252_v52 }
 0x2e9   : > { %v2669_v39 = vadd.f32 %v2619_v62, %v2300_v30  ;;  %v2858_v11 = vpop.f32.mrf.mxu0  ;;  %v2629_v47 = vpop.f32.mrf.mxu3 }
 0x2eb   : > { %v2905_v44 = vadd.f32 %v2855_v13, %v2669_v39 }
 0x2ed   : > { %2941 = vst [vmem:[%s4343_s14 + $0xd8] sm:$0xff] %v2905_v44 }
 0x2ee   : > { %v2253_v27 = vpop.f32.mrf.mxu2 }
 0x2ef   : > { %v2301_v49 = vadd.f32 %v2253_v27, %v1940_v29  ;;  %v1894_v10 = vpop.f32.mrf.mxu1 }
 0x2f0   : > { %v1941_v15 = vadd.f32 %v1894_v10, %v4265_v55 }
 0x2f1   : > { %v2670_v20 = vadd.f32 %v2622_v14, %v2301_v49  ;;  %v2860_v5 = vpop.f32.mrf.mxu0  ;;  %v2632_v12 = vpop.f32.mrf.mxu3 }
 0x2f3   : > { %v2906_v54 = vadd.f32 %v2858_v11, %v2670_v20 }
 0x2f5   : > { %2942 = vst [vmem:[%s4343_s14 + $0xe0] sm:$0xff] %v2906_v54 }
 0x2f6   : > { %v2255_v7 = vpop.f32.mrf.mxu2 }
 0x2f7   : > { %v2302_v17 = vadd.f32 %v2255_v7, %v1941_v15  ;;  %v1897_v42 = vpop.f32.mrf.mxu1 }
 0x2f8   : > { %v1942_v52 = vadd.f32 %v1897_v42, %v4274_v3 }
 0x2f9   : > { %v2671_v34 = vadd.f32 %v2624_v21, %v2302_v17  ;;  %v2863_v28 = vpop.f32.mrf.mxu0  ;;  %v2634_v36 = vpop.f32.mrf.mxu3 }
 0x2fb   : > { %v2907_v32 = vadd.f32 %v2860_v5, %v2671_v34 }
 0x2fd   : > { %2943 = vst [vmem:[%s4343_s14 + $0xe8] sm:$0xff] %v2907_v32 }
 0x2fe   : > { %v2258_v58 = vpop.f32.mrf.mxu2 }
 0x2ff   : > { %v2303_v26 = vadd.f32 %v2258_v58, %v1942_v52  ;;  %v1899_v59 = vpop.f32.mrf.mxu1 }
 0x300   : > { %v1943_v55 = vadd.f32 %v1899_v59, %v4287_v63 }
 0x301   : > { %v2672_v9 = vadd.f32 %v2627_v23, %v2303_v26  ;;  %v2865_v6 = vpop.f32.mrf.mxu0 }
 0x303   : > { %v2908_v2 = vadd.f32 %v2863_v28, %v2672_v9 }
 0x305   : > { %2944 = vst [vmem:[%s4343_s14 + $0xf0] sm:$0xff] %v2908_v2 }
 0x306   : > { %v2260_v22 = vpop.f32.mrf.mxu2 }
 0x307   : > { %v2304_v16 = vadd.f32 %v2260_v22, %v1943_v55  ;;  %v1902_v43 = vpop.f32.mrf.mxu1 }
 0x308   : > { %v1944_v3 = vadd.f32 %v1902_v43, %v4296_v53  ;;  %v2637_v53 = vpop.f32.mrf.mxu3 }
 0x309   : > { %v2673_v56 = vadd.f32 %v2629_v47, %v2304_v16  ;;  %v2868_v46 = vpop.f32.mrf.mxu0 }
 0x30b   : > { %v2909_v48 = vadd.f32 %v2865_v6, %v2673_v56 }
 0x30d   : > { %2945 = vst [vmem:[%s4343_s14 + $0xf8] sm:$0xff] %v2909_v48 }
 0x30e   : > { %v2263_v4 = vpop.f32.mrf.mxu2 }
 0x30f   : > { %v2305_v0 = vadd.f32 %v2263_v4, %v1944_v3  ;;  %v1904_v18 = vpop.f32.mrf.mxu1 }
 0x310   : > { %v1945_v63 = vadd.f32 %v1904_v18, %v4309_v1  ;;  %v2639_v30 = vpop.f32.mrf.mxu3 }
 0x311   : > { %v2674_v25 = vadd.f32 %v2632_v12, %v2305_v0  ;;  %v2870_v45 = vpop.f32.mrf.mxu0 }
 0x313   : > { %v2910_v57 = vadd.f32 %v2868_v46, %v2674_v25 }
 0x315   : > { %2946 = vst [vmem:[%s4343_s14 + $0x100] sm:$0xff] %v2910_v57 }
 0x316   : > { %v2265_v62 = vpop.f32.mrf.mxu2 }
 0x317   : > { %v2306_v37 = vadd.f32 %v2265_v62, %v1945_v63  ;;  %v1907_v60 = vpop.f32.mrf.mxu1 }
 0x318   : > { %v1946_v41 = vadd.f32 %v1907_v60, %v4318_v40 }
 0x319   : > { %v2675_v33 = vadd.f32 %v2634_v36, %v2306_v37  ;;  %v2873_v51 = vpop.f32.mrf.mxu0 }
 0x31b   : > { %v2911_v8 = vadd.f32 %v2870_v45, %v2675_v33 }
 0x31d   : > { %2947 = vst [vmem:[%s4343_s14 + $0x108] sm:$0xff] %v2911_v8 }
 0x31e   : > { %v2268_v35 = vpop.f32.mrf.mxu2 }
 0x31f   : > { %v2307_v31 = vadd.f32 %v2268_v35, %v1946_v41  ;;  %v1909_v14 = vpop.f32.mrf.mxu1 }
 0x320   : > { %v1947_v1 = vadd.f32 %v1909_v14, %v4331_v24 }
 0x321   : > { %v2676_v13 = vadd.f32 %v2637_v53, %v2307_v31  ;;  %v2875_v39 = vpop.f32.mrf.mxu0 }
 0x323   : > { %v2912_v19 = vadd.f32 %v2873_v51, %v2676_v13 }
 0x325   : > { %2948 = vst [vmem:[%s4343_s14 + $0x110] sm:$0xff] %v2912_v19 }
 0x326   : > { %v2270_v50 = vpop.f32.mrf.mxu2 }
 0x327   : > { %v2308_v38 = vadd.f32 %v2270_v50, %v1947_v1 }
 0x329   : > { %v2677_v61 = vadd.f32 %v2639_v30, %v2308_v38 }
 0x32b   : > { %v2913_v11 = vadd.f32 %v2875_v39, %v2677_v61 }
 0x32d   : > { %2949 = vst [vmem:[%s4343_s14 + $0x118] sm:$0xff] %v2913_v11 }
 0x32e PF: > { %s12_s11 = sadd.s32 1, %s3543_s11   ;;  %s4583_s9 = smov %s3539_s10 }
 0x32f   : > { %p9_p5 = scmp.ge.s32.totalorder %s12_s11, 4   ;;  %s4584_s10 = smov %s4586_s12 }
 0x331   :  { %11 = sbr.rel (!%p9_p5) target bundleno = 2 (0x2), region = 66 }

</bundles_post_ra>
